<compile_context>
chip_gen: v6e
topology: v6e:2x2x1
jax: 0.10.0
libtpu: 0.0.40
codegen_flags: <defaults>
</compile_context>

<pallas_src>
import functools

import jax
import jax.numpy as jnp
import numpy as np
from jax.experimental import pallas as pl
from jax.experimental.pallas import tpu as pltpu

EPS = 1e-5  # InstanceNorm2d default eps


# --------------------------------------------------------------------------
# Fused per-batch Encoder kernel
# --------------------------------------------------------------------------
def _encoder_kernel(*refs, H, W, dilations, num1, num2, cd):
    L = len(dilations)
    s_ref, m_ref = refs[0], refs[1]
    layer_refs = refs[2:2 + 4 * L]
    wl_ref, bl_ref = refs[2 + 4 * L], refs[3 + 4 * L]
    out_ref = refs[4 + 4 * L]

    f32 = jnp.float32
    hw = H * W

    # ---- hoisted once per grid step: mask + flattened (y, x) coordinates ----
    m = m_ref[0].astype(f32)                                   # (1, hw)
    idx = jax.lax.broadcasted_iota(jnp.int32, (1, hw), 1)
    if W & (W - 1) == 0:                                       # cheap bit ops
        yy = idx >> (W.bit_length() - 1)
        xx = idx & (W - 1)
    else:
        yy = idx // W
        xx = idx - yy * W

    def inorm(p):
        """InstanceNorm2d (affine=False): per-channel normalize over HW."""
        mu = jnp.sum(p, axis=1, keepdims=True) * (1.0 / hw)
        d = p - mu
        var = jnp.sum(d * d, axis=1, keepdims=True) * (1.0 / hw)
        return d * jax.lax.rsqrt(var + EPS)

    # features = list of (C_j, hw) f32 pieces in torch.cat order
    # [aspp_{i-1}, ..., aspp_0, input]; the concat is never materialized.
    pieces = [s_ref[0].astype(f32)]

    for i, dil in enumerate(dilations):
        w1 = layer_refs[4 * i][...]                            # (num1, cin)  cd
        b1 = layer_refs[4 * i + 1][...].astype(f32)            # (num1, 1)
        w3a = layer_refs[4 * i + 2][...]                       # (9*num2, num1) cd
        b3 = layer_refs[4 * i + 3][...].astype(f32)            # (num2, 1)

        # features = features * mask (exact repeated multiply, as in torch)
        pieces = [p * m for p in pieces]

        # _DenseAsppBlock: [IN] -> ReLU -> Conv1x1 -> IN -> ReLU -> dilated 3x3
        xs = pieces if i == 0 else [inorm(p) for p in pieces]  # bn_start = i != 0
        xs = [jnp.maximum(p, 0.0) for p in xs]

        # Conv1x1 over the (virtual) concat = sum of per-piece MXU matmuls.
        h1 = None
        off = 0
        for p in xs:
            c = p.shape[0]
            t = jnp.dot(w1[:, off:off + c], p.astype(cd),
                        preferred_element_type=f32)
            h1 = t if h1 is None else h1 + t
            off += c
        h1 = jnp.maximum(inorm(h1 + b1), 0.0)                  # (num1, hw)

        # Dilated 3x3: all 9 tap responses in one MXU matmul -> (9*num2, hw),
        # then 8 masked lane-rolls of full (num2, hw) slabs.
        p9 = jnp.dot(w3a, h1.astype(cd), preferred_element_type=f32)

        mxm = (xx >= dil).astype(f32)                          # dx = -1 valid
        mxp = (xx < W - dil).astype(f32)                       # dx = +1 valid
        mym = (yy >= dil).astype(f32)                          # dy = -1 valid
        myp = (yy < H - dil).astype(f32)                       # dy = +1 valid

        acc = p9[4 * num2:5 * num2]                            # center tap
        k = 0
        for dy in (-1, 0, 1):
            for dx in (-1, 0, 1):
                if dy == 0 and dx == 0:
                    k += 1
                    continue
                offs = dy * dil * W + dx * dil                 # flat sample offset
                slab = pltpu.roll(p9[k * num2:(k + 1) * num2],
                                  (-offs) % hw, axis=1)        # out[i] = p9[i+offs]
                if dx != 0:
                    slab = slab * (mxm if dx < 0 else mxp)
                if dy != 0:
                    slab = slab * (mym if dy < 0 else myp)
                acc = acc + slab
                k += 1
        aspp = acc + b3                                        # (num2, hw)
        # TODO(synk): training-mode Dropout2d(p=dropout0) would mask whole
        #   channels here (pltpu.prng_*); inference path is identity.

        pieces = [aspp] + pieces                               # torch.cat([aspp, features])

    # features = features * mask ; out = self.last's Conv1x1 (Dropout2d = id)
    pieces = [p * m for p in pieces]
    wl = wl_ref[...]
    out = None
    off = 0
    for p in pieces:
        c = p.shape[0]
        t = jnp.dot(wl[:, off:off + c], p.astype(cd), preferred_element_type=f32)
        out = t if out is None else out + t
        off += c
    out_ref[0] = (out + bl_ref[...].astype(f32)).astype(out_ref.dtype)


# --------------------------------------------------------------------------
# Wrapper
# --------------------------------------------------------------------------
def _vmem_limit(working_bytes, frac=0.8, slack=4 << 20):
    """Generation-aware scoped-VMEM budget: ~80% of physical capacity, never a
    hard 64 MiB clamp (v7x has 64 MiB physical, v5e/v6e have 128 MiB)."""
    try:
        cap = int(pltpu.get_tpu_info().vmem_capacity_bytes)
    except Exception:  # non-TPU / interpret fallback
        cap = 128 << 20
    want = int(working_bytes) + slack
    return int(min(int(cap * frac), max(16 << 20, want)))


def encoder_forward(S, mask, params, dilations, *, compute_dtype=jnp.bfloat16):
    """Encoder.forward(input, mask), inference path.

    S:    (b, d_model, H, W)   input feature map
    mask: (b, 1, H, W)         multiplicative mask
    compute_dtype: dtype of MXU operands (bf16 default — f32 accumulation).
    """
    f32 = jnp.float32
    cd = compute_dtype
    b, d_model, h, w = S.shape
    hw = h * w
    L = len(dilations)
    num1 = params["layers"][0]["w1"].shape[0]
    num2 = params["layers"][0]["w3"].shape[0]
    cfinal = d_model + L * num2

    S_f = S.reshape(b, d_model, hw).astype(cd)
    m_f = mask.reshape(b, 1, hw).astype(f32)

    inputs = [S_f, m_f]
    in_specs = [
        pl.BlockSpec((1, d_model, hw), lambda i: (i, 0, 0)),
        pl.BlockSpec((1, 1, hw), lambda i: (i, 0, 0)),
    ]
    for li in range(L):
        lp = params["layers"][li]
        cin = lp["w1"].shape[1]
        w1 = lp["w1"].astype(cd)                               # (num1, cin)
        b1 = lp["b1"].reshape(num1, 1).astype(f32)
        # tap-major weight: W_all[k*num2 + o, c] = w3[o, c, ky, kx], k = ky*3+kx
        w3a = jnp.transpose(lp["w3"], (2, 3, 0, 1)).reshape(9 * num2, num1).astype(cd)
        b3 = lp["b3"].reshape(num2, 1).astype(f32)
        inputs += [w1, b1, w3a, b3]
        in_specs += [
            pl.BlockSpec((num1, cin), lambda i: (0, 0)),
            pl.BlockSpec((num1, 1), lambda i: (0, 0)),
            pl.BlockSpec((9 * num2, num1), lambda i: (0, 0)),
            pl.BlockSpec((num2, 1), lambda i: (0, 0)),
        ]
    wl = params["wl"].astype(cd)                               # (d_model, cfinal)
    bl = params["bl"].reshape(d_model, 1).astype(f32)
    inputs += [wl, bl]
    in_specs += [
        pl.BlockSpec((d_model, cfinal), lambda i: (0, 0)),
        pl.BlockSpec((d_model, 1), lambda i: (0, 0)),
    ]

    itemsize = jnp.dtype(cd).itemsize
    working = hw * (2 * d_model * itemsize                      # double-buffered S block
                    + 4 * (cfinal + num1 + 9 * num2 + num2 + 2 * d_model + 8))

    out = pl.pallas_call(
        functools.partial(_encoder_kernel, H=h, W=w, dilations=tuple(dilations),
                          num1=num1, num2=num2, cd=cd),
        out_shape=jax.ShapeDtypeStruct((b, d_model, hw), f32),
        grid=(b,),
        in_specs=in_specs,
        out_specs=pl.BlockSpec((1, d_model, hw), lambda i: (i, 0, 0)),
        compiler_params=pltpu.CompilerParams(
            dimension_semantics=("parallel",),
            vmem_limit_bytes=_vmem_limit(working)),
    )(*inputs)
    return out.reshape(b, d_model, h, w)


# --------------------------------------------------------------------------
# Deterministic parameter init (shapes from the module's __init__)
# --------------------------------------------------------------------------
def init_params(key, d_model, num1, num2, num_layers):
    f32 = jnp.float32
    keys = jax.random.split(key, num_layers + 1)
    layers = []
    for i in range(num_layers):
        cin = d_model + i * num2                               # d_model + i*d_features1
        k1, k2, k3, k4 = jax.random.split(keys[i], 4)
        layers.append(dict(
            w1=jax.random.uniform(k1, (num1, cin), f32, -1.0, 1.0) / np.sqrt(cin),
            b1=jax.random.uniform(k2, (num1,), f32, -1.0, 1.0) / np.sqrt(cin),
            w3=jax.random.uniform(k3, (num2, num1, 3, 3), f32, -1.0, 1.0) / np.sqrt(num1 * 9),
            b3=jax.random.uniform(k4, (num2,), f32, -1.0, 1.0) / np.sqrt(num1 * 9),
        ))
    cfinal = d_model + num_layers * num2
    kl1, kl2 = jax.random.split(keys[-1], 2)
    wl = jax.random.uniform(kl1, (d_model, cfinal), f32, -1.0, 1.0) / np.sqrt(cfinal)
    bl = jax.random.uniform(kl2, (d_model,), f32, -1.0, 1.0) / np.sqrt(cfinal)
    return dict(layers=layers, wl=wl, bl=bl)


# --------------------------------------------------------------------------
# Pure-JAX reference (NCHW, mirrors the PyTorch forward, inference mode)
# --------------------------------------------------------------------------
def reference_forward(S, mask, params, dilations):
    hi = jax.lax.Precision.HIGHEST

    def inorm(x):
        mu = jnp.mean(x, axis=(2, 3), keepdims=True)
        var = jnp.mean((x - mu) ** 2, axis=(2, 3), keepdims=True)
        return (x - mu) / jnp.sqrt(var + EPS)

    feats = S
    for i, dil in enumerate(dilations):
        feats = feats * mask
        lp = params["layers"][i]
        x = feats if i == 0 else inorm(feats)
        x = jnp.maximum(x, 0.0)
        h1 = jnp.einsum("oc,bchw->bohw", lp["w1"], x, precision=hi)
        h1 = h1 + lp["b1"].reshape(1, -1, 1, 1)
        h1 = jnp.maximum(inorm(h1), 0.0)
        aspp = jax.lax.conv_general_dilated(
            h1, lp["w3"], window_strides=(1, 1),
            padding=((dil, dil), (dil, dil)), rhs_dilation=(dil, dil),
            dimension_numbers=("NCHW", "OIHW", "NCHW"), precision=hi)
        aspp = aspp + lp["b3"].reshape(1, -1, 1, 1)
        feats = jnp.concatenate([aspp, feats], axis=1)
    feats = feats * mask
    out = jnp.einsum("oc,bchw->bohw", params["wl"], feats, precision=hi)
    return out + params["bl"].reshape(1, -1, 1, 1)


# --------------------------------------------------------------------------
if __name__ == "__main__":
    key = jax.random.PRNGKey(0)
    k_s, k_m, k_p = jax.random.split(key, 3)

    # small demo config (config.d_model, d_features0, d_features1, asppList)
    b, d_model, h, w = 2, 8, 16, 16
    num_layers, aspp_list = 2, (1, 2)
    num1, num2 = 16, 8

    S = jax.random.normal(k_s, (b, d_model, h, w), jnp.float32)
    mask = (jax.random.uniform(k_m, (b, 1, h, w)) > 0.3).astype(jnp.float32)
    params = init_params(k_p, d_model, num1, num2, num_layers)

    # production default: bf16 MXU operands (f32 accumulation)
    out_bf16 = encoder_forward(S, mask, params, aspp_list)
    jax.block_until_ready(out_bf16)

    # exact f32 path validated against the pure-JAX reference
    out_f32 = encoder_forward(S, mask, params, aspp_list,
                              compute_dtype=jnp.float32)
    jax.block_until_ready(out_f32)
    ref = reference_forward(S, mask, params, aspp_list)
    np.testing.assert_allclose(np.asarray(out_f32), np.asarray(ref),
                               rtol=2e-2, atol=2e-3)

    print("KERNEL_OK")
</pallas_src>

<mosaic_0001>
module attributes {stable_mosaic.version = 11 : i64} {
  func.func @_encoder_kernel(%arg0: i32, %arg1: memref<1x8x256xbf16, #tpu.memory_space<vmem>>, %arg2: memref<1x1x256xf32, #tpu.memory_space<vmem>>, %arg3: memref<16x8xbf16, #tpu.memory_space<vmem>>, %arg4: memref<16x1xf32, #tpu.memory_space<vmem>>, %arg5: memref<72x16xbf16, #tpu.memory_space<vmem>>, %arg6: memref<8x1xf32, #tpu.memory_space<vmem>>, %arg7: memref<16x16xbf16, #tpu.memory_space<vmem>>, %arg8: memref<16x1xf32, #tpu.memory_space<vmem>>, %arg9: memref<72x16xbf16, #tpu.memory_space<vmem>>, %arg10: memref<8x1xf32, #tpu.memory_space<vmem>>, %arg11: memref<8x24xbf16, #tpu.memory_space<vmem>>, %arg12: memref<8x1xf32, #tpu.memory_space<vmem>>, %arg13: memref<1x8x256xf32, #tpu.memory_space<vmem>>) attributes {dimension_semantics = [#tpu.dimension_semantics<parallel>], iteration_bounds = array<i64: 2>, scalar_prefetch = 0 : i64, scratch_operands = 0 : i64, tpu.core_type = #tpu.core_type<tc>, window_params = [{transform_indices = @transform_0, window_bounds = array<i64: 1, 8, 256>}, {transform_indices = @transform_1, window_bounds = array<i64: 1, 1, 256>}, {pipeline_mode = #tpu.pipeline_mode<synchronous>, transform_indices = @transform_2, window_bounds = array<i64: 16, 8>}, {pipeline_mode = #tpu.pipeline_mode<synchronous>, transform_indices = @transform_3, window_bounds = array<i64: 16, 1>}, {pipeline_mode = #tpu.pipeline_mode<synchronous>, transform_indices = @transform_4, window_bounds = array<i64: 72, 16>}, {pipeline_mode = #tpu.pipeline_mode<synchronous>, transform_indices = @transform_5, window_bounds = array<i64: 8, 1>}, {pipeline_mode = #tpu.pipeline_mode<synchronous>, transform_indices = @transform_6, window_bounds = array<i64: 16, 16>}, {pipeline_mode = #tpu.pipeline_mode<synchronous>, transform_indices = @transform_7, window_bounds = array<i64: 16, 1>}, {pipeline_mode = #tpu.pipeline_mode<synchronous>, transform_indices = @transform_8, window_bounds = array<i64: 72, 16>}, {pipeline_mode = #tpu.pipeline_mode<synchronous>, transform_indices = @transform_9, window_bounds = array<i64: 8, 1>}, {pipeline_mode = #tpu.pipeline_mode<synchronous>, transform_indices = @transform_10, window_bounds = array<i64: 8, 24>}, {pipeline_mode = #tpu.pipeline_mode<synchronous>, transform_indices = @transform_11, window_bounds = array<i64: 8, 1>}, {transform_indices = @transform_12, window_bounds = array<i64: 1, 8, 256>}]} {
    %c0 = arith.constant 0 : index
    %c0_0 = arith.constant 0 : index
    %c0_1 = arith.constant 0 : index
    %0 = vector.load %arg2[%c0, %c0_0, %c0_1] : memref<1x1x256xf32, #tpu.memory_space<vmem>>, vector<1x1x256xf32>
    %1 = vector.shape_cast %0 : vector<1x1x256xf32> to vector<1x256xf32>
    %2 = tpu.iota {dimensions = array<i32: 1>} : vector<1x256xi32>
    %c4_i32 = arith.constant 4 : i32
    %3 = vector.broadcast %c4_i32 : i32 to vector<1x256xi32>
    %4 = arith.shrsi %2, %3 : vector<1x256xi32>
    %c15_i32 = arith.constant 15 : i32
    %5 = vector.broadcast %c15_i32 : i32 to vector<1x256xi32>
    %6 = arith.andi %2, %5 : vector<1x256xi32>
    %c0_2 = arith.constant 0 : index
    %c0_3 = arith.constant 0 : index
    %c0_4 = arith.constant 0 : index
    %7 = vector.load %arg1[%c0_2, %c0_3, %c0_4] : memref<1x8x256xbf16, #tpu.memory_space<vmem>>, vector<1x8x256xbf16>
    %8 = vector.shape_cast %7 : vector<1x8x256xbf16> to vector<8x256xbf16>
    %9 = arith.extf %8 : vector<8x256xbf16> to vector<8x256xf32>
    %c0_5 = arith.constant 0 : index
    %c0_6 = arith.constant 0 : index
    %10 = vector.load %arg3[%c0_5, %c0_6] : memref<16x8xbf16, #tpu.memory_space<vmem>>, vector<16x8xbf16>
    %c0_7 = arith.constant 0 : index
    %c0_8 = arith.constant 0 : index
    %11 = vector.load %arg4[%c0_7, %c0_8] : memref<16x1xf32, #tpu.memory_space<vmem>>, vector<16x1xf32>
    %c0_9 = arith.constant 0 : index
    %c0_10 = arith.constant 0 : index
    %12 = vector.load %arg5[%c0_9, %c0_10] : memref<72x16xbf16, #tpu.memory_space<vmem>>, vector<72x16xbf16>
    %c0_11 = arith.constant 0 : index
    %c0_12 = arith.constant 0 : index
    %13 = vector.load %arg6[%c0_11, %c0_12] : memref<8x1xf32, #tpu.memory_space<vmem>>, vector<8x1xf32>
    %14 = vector.broadcast %1 : vector<1x256xf32> to vector<8x256xf32>
    %15 = arith.mulf %9, %14 : vector<8x256xf32>
    %cst = arith.constant 0.000000e+00 : f32
    %16 = vector.broadcast %cst : f32 to vector<8x256xf32>
    %17 = arith.maximumf %15, %16 : vector<8x256xf32>
    %18 = arith.truncf %17 : vector<8x256xf32> to vector<8x256xbf16>
    %cst_13 = arith.constant dense<0.000000e+00> : vector<16x256xf32>
    %19 = tpu.matmul %10, %18, %cst_13 {dimension_numbers = #tpu.dot_dimension_numbers<[1], [0], [0], [1], [0, 0, 1, 1], [], []>} : vector<16x8xbf16>, vector<8x256xbf16>, vector<16x256xf32> -> vector<16x256xf32>
    %20 = vector.broadcast %11 : vector<16x1xf32> to vector<16x256xf32>
    %21 = arith.addf %19, %20 : vector<16x256xf32>
    %cst_14 = arith.constant dense<0.000000e+00> : vector<16xf32>
    %22 = vector.multi_reduction <add>, %21, %cst_14 [1] : vector<16x256xf32> to vector<16xf32>
    %23 = vector.shape_cast %22 : vector<16xf32> to vector<16x1xf32>
    %cst_15 = arith.constant 3.906250e-03 : f32
    %24 = vector.broadcast %cst_15 : f32 to vector<16x1xf32>
    %25 = arith.mulf %23, %24 : vector<16x1xf32>
    %26 = vector.broadcast %25 : vector<16x1xf32> to vector<16x256xf32>
    %27 = arith.subf %21, %26 : vector<16x256xf32>
    %28 = arith.mulf %27, %27 : vector<16x256xf32>
    %cst_16 = arith.constant dense<0.000000e+00> : vector<16xf32>
    %29 = vector.multi_reduction <add>, %28, %cst_16 [1] : vector<16x256xf32> to vector<16xf32>
    %30 = vector.shape_cast %29 : vector<16xf32> to vector<16x1xf32>
    %cst_17 = arith.constant 3.906250e-03 : f32
    %31 = vector.broadcast %cst_17 : f32 to vector<16x1xf32>
    %32 = arith.mulf %30, %31 : vector<16x1xf32>
    %cst_18 = arith.constant 9.99999974E-6 : f32
    %33 = vector.broadcast %cst_18 : f32 to vector<16x1xf32>
    %34 = arith.addf %32, %33 : vector<16x1xf32>
    %35 = math.rsqrt %34 : vector<16x1xf32>
    %36 = vector.broadcast %35 : vector<16x1xf32> to vector<16x256xf32>
    %37 = arith.mulf %27, %36 : vector<16x256xf32>
    %cst_19 = arith.constant 0.000000e+00 : f32
    %38 = vector.broadcast %cst_19 : f32 to vector<16x256xf32>
    %39 = arith.maximumf %37, %38 : vector<16x256xf32>
    %40 = arith.truncf %39 : vector<16x256xf32> to vector<16x256xbf16>
    %cst_20 = arith.constant dense<0.000000e+00> : vector<72x256xf32>
    %41 = tpu.matmul %12, %40, %cst_20 {dimension_numbers = #tpu.dot_dimension_numbers<[1], [0], [0], [1], [0, 0, 1, 1], [], []>} : vector<72x16xbf16>, vector<16x256xbf16>, vector<72x256xf32> -> vector<72x256xf32>
    %c1_i32 = arith.constant 1 : i32
    %42 = vector.broadcast %c1_i32 : i32 to vector<1x256xi32>
    %43 = arith.cmpi sge, %6, %42 : vector<1x256xi32>
    %44 = arith.extui %43 : vector<1x256xi1> to vector<1x256xi32>
    %45 = arith.sitofp %44 : vector<1x256xi32> to vector<1x256xf32>
    %c15_i32_21 = arith.constant 15 : i32
    %46 = vector.broadcast %c15_i32_21 : i32 to vector<1x256xi32>
    %47 = arith.cmpi slt, %6, %46 : vector<1x256xi32>
    %48 = arith.extui %47 : vector<1x256xi1> to vector<1x256xi32>
    %49 = arith.sitofp %48 : vector<1x256xi32> to vector<1x256xf32>
    %c1_i32_22 = arith.constant 1 : i32
    %50 = vector.broadcast %c1_i32_22 : i32 to vector<1x256xi32>
    %51 = arith.cmpi sge, %4, %50 : vector<1x256xi32>
    %52 = arith.extui %51 : vector<1x256xi1> to vector<1x256xi32>
    %53 = arith.sitofp %52 : vector<1x256xi32> to vector<1x256xf32>
    %c15_i32_23 = arith.constant 15 : i32
    %54 = vector.broadcast %c15_i32_23 : i32 to vector<1x256xi32>
    %55 = arith.cmpi slt, %4, %54 : vector<1x256xi32>
    %56 = arith.extui %55 : vector<1x256xi1> to vector<1x256xi32>
    %57 = arith.sitofp %56 : vector<1x256xi32> to vector<1x256xf32>
    %58 = vector.extract_strided_slice %41 {offsets = [32, 0], sizes = [8, 256], strides = [1, 1]} : vector<72x256xf32> to vector<8x256xf32>
    %59 = vector.extract_strided_slice %41 {offsets = [0, 0], sizes = [8, 256], strides = [1, 1]} : vector<72x256xf32> to vector<8x256xf32>
    %c17_i32 = arith.constant 17 : i32
    %60 = tpu.dynamic_rotate %59 by %c17_i32 dim 1 : vector<8x256xf32>, i32 -> vector<8x256xf32>
    %61 = vector.broadcast %45 : vector<1x256xf32> to vector<8x256xf32>
    %62 = arith.mulf %60, %61 : vector<8x256xf32>
    %63 = vector.broadcast %53 : vector<1x256xf32> to vector<8x256xf32>
    %64 = arith.mulf %62, %63 : vector<8x256xf32>
    %65 = arith.addf %58, %64 : vector<8x256xf32>
    %66 = vector.extract_strided_slice %41 {offsets = [8, 0], sizes = [8, 256], strides = [1, 1]} : vector<72x256xf32> to vector<8x256xf32>
    %c16_i32 = arith.constant 16 : i32
    %67 = tpu.dynamic_rotate %66 by %c16_i32 dim 1 : vector<8x256xf32>, i32 -> vector<8x256xf32>
    %68 = vector.broadcast %53 : vector<1x256xf32> to vector<8x256xf32>
    %69 = arith.mulf %67, %68 : vector<8x256xf32>
    %70 = arith.addf %65, %69 : vector<8x256xf32>
    %71 = vector.extract_strided_slice %41 {offsets = [16, 0], sizes = [8, 256], strides = [1, 1]} : vector<72x256xf32> to vector<8x256xf32>
    %c15_i32_24 = arith.constant 15 : i32
    %72 = tpu.dynamic_rotate %71 by %c15_i32_24 dim 1 : vector<8x256xf32>, i32 -> vector<8x256xf32>
    %73 = vector.broadcast %49 : vector<1x256xf32> to vector<8x256xf32>
    %74 = arith.mulf %72, %73 : vector<8x256xf32>
    %75 = vector.broadcast %53 : vector<1x256xf32> to vector<8x256xf32>
    %76 = arith.mulf %74, %75 : vector<8x256xf32>
    %77 = arith.addf %70, %76 : vector<8x256xf32>
    %78 = vector.extract_strided_slice %41 {offsets = [24, 0], sizes = [8, 256], strides = [1, 1]} : vector<72x256xf32> to vector<8x256xf32>
    %c1_i32_25 = arith.constant 1 : i32
    %79 = tpu.dynamic_rotate %78 by %c1_i32_25 dim 1 : vector<8x256xf32>, i32 -> vector<8x256xf32>
    %80 = vector.broadcast %45 : vector<1x256xf32> to vector<8x256xf32>
    %81 = arith.mulf %79, %80 : vector<8x256xf32>
    %82 = arith.addf %77, %81 : vector<8x256xf32>
    %83 = vector.extract_strided_slice %41 {offsets = [40, 0], sizes = [8, 256], strides = [1, 1]} : vector<72x256xf32> to vector<8x256xf32>
    %c255_i32 = arith.constant 255 : i32
    %84 = tpu.dynamic_rotate %83 by %c255_i32 dim 1 : vector<8x256xf32>, i32 -> vector<8x256xf32>
    %85 = vector.broadcast %49 : vector<1x256xf32> to vector<8x256xf32>
    %86 = arith.mulf %84, %85 : vector<8x256xf32>
    %87 = arith.addf %82, %86 : vector<8x256xf32>
    %88 = vector.extract_strided_slice %41 {offsets = [48, 0], sizes = [8, 256], strides = [1, 1]} : vector<72x256xf32> to vector<8x256xf32>
    %c241_i32 = arith.constant 241 : i32
    %89 = tpu.dynamic_rotate %88 by %c241_i32 dim 1 : vector<8x256xf32>, i32 -> vector<8x256xf32>
    %90 = vector.broadcast %45 : vector<1x256xf32> to vector<8x256xf32>
    %91 = arith.mulf %89, %90 : vector<8x256xf32>
    %92 = vector.broadcast %57 : vector<1x256xf32> to vector<8x256xf32>
    %93 = arith.mulf %91, %92 : vector<8x256xf32>
    %94 = arith.addf %87, %93 : vector<8x256xf32>
    %95 = vector.extract_strided_slice %41 {offsets = [56, 0], sizes = [8, 256], strides = [1, 1]} : vector<72x256xf32> to vector<8x256xf32>
    %c240_i32 = arith.constant 240 : i32
    %96 = tpu.dynamic_rotate %95 by %c240_i32 dim 1 : vector<8x256xf32>, i32 -> vector<8x256xf32>
    %97 = vector.broadcast %57 : vector<1x256xf32> to vector<8x256xf32>
    %98 = arith.mulf %96, %97 : vector<8x256xf32>
    %99 = arith.addf %94, %98 : vector<8x256xf32>
    %100 = vector.extract_strided_slice %41 {offsets = [64, 0], sizes = [8, 256], strides = [1, 1]} : vector<72x256xf32> to vector<8x256xf32>
    %c239_i32 = arith.constant 239 : i32
    %101 = tpu.dynamic_rotate %100 by %c239_i32 dim 1 : vector<8x256xf32>, i32 -> vector<8x256xf32>
    %102 = vector.broadcast %49 : vector<1x256xf32> to vector<8x256xf32>
    %103 = arith.mulf %101, %102 : vector<8x256xf32>
    %104 = vector.broadcast %57 : vector<1x256xf32> to vector<8x256xf32>
    %105 = arith.mulf %103, %104 : vector<8x256xf32>
    %106 = arith.addf %99, %105 : vector<8x256xf32>
    %107 = vector.broadcast %13 : vector<8x1xf32> to vector<8x256xf32>
    %108 = arith.addf %106, %107 : vector<8x256xf32>
    %c0_26 = arith.constant 0 : index
    %c0_27 = arith.constant 0 : index
    %109 = vector.load %arg7[%c0_26, %c0_27] : memref<16x16xbf16, #tpu.memory_space<vmem>>, vector<16x16xbf16>
    %c0_28 = arith.constant 0 : index
    %c0_29 = arith.constant 0 : index
    %110 = vector.load %arg8[%c0_28, %c0_29] : memref<16x1xf32, #tpu.memory_space<vmem>>, vector<16x1xf32>
    %c0_30 = arith.constant 0 : index
    %c0_31 = arith.constant 0 : index
    %111 = vector.load %arg9[%c0_30, %c0_31] : memref<72x16xbf16, #tpu.memory_space<vmem>>, vector<72x16xbf16>
    %c0_32 = arith.constant 0 : index
    %c0_33 = arith.constant 0 : index
    %112 = vector.load %arg10[%c0_32, %c0_33] : memref<8x1xf32, #tpu.memory_space<vmem>>, vector<8x1xf32>
    %113 = vector.broadcast %1 : vector<1x256xf32> to vector<8x256xf32>
    %114 = arith.mulf %108, %113 : vector<8x256xf32>
    %115 = vector.broadcast %1 : vector<1x256xf32> to vector<8x256xf32>
    %116 = arith.mulf %15, %115 : vector<8x256xf32>
    %cst_34 = arith.constant dense<0.000000e+00> : vector<8xf32>
    %117 = vector.multi_reduction <add>, %114, %cst_34 [1] : vector<8x256xf32> to vector<8xf32>
    %118 = vector.shape_cast %117 : vector<8xf32> to vector<8x1xf32>
    %cst_35 = arith.constant 3.906250e-03 : f32
    %119 = vector.broadcast %cst_35 : f32 to vector<8x1xf32>
    %120 = arith.mulf %118, %119 : vector<8x1xf32>
    %121 = vector.broadcast %120 : vector<8x1xf32> to vector<8x256xf32>
    %122 = arith.subf %114, %121 : vector<8x256xf32>
    %123 = arith.mulf %122, %122 : vector<8x256xf32>
    %cst_36 = arith.constant dense<0.000000e+00> : vector<8xf32>
    %124 = vector.multi_reduction <add>, %123, %cst_36 [1] : vector<8x256xf32> to vector<8xf32>
    %125 = vector.shape_cast %124 : vector<8xf32> to vector<8x1xf32>
    %cst_37 = arith.constant 3.906250e-03 : f32
    %126 = vector.broadcast %cst_37 : f32 to vector<8x1xf32>
    %127 = arith.mulf %125, %126 : vector<8x1xf32>
    %cst_38 = arith.constant 9.99999974E-6 : f32
    %128 = vector.broadcast %cst_38 : f32 to vector<8x1xf32>
    %129 = arith.addf %127, %128 : vector<8x1xf32>
    %130 = math.rsqrt %129 : vector<8x1xf32>
    %131 = vector.broadcast %130 : vector<8x1xf32> to vector<8x256xf32>
    %132 = arith.mulf %122, %131 : vector<8x256xf32>
    %cst_39 = arith.constant dense<0.000000e+00> : vector<8xf32>
    %133 = vector.multi_reduction <add>, %116, %cst_39 [1] : vector<8x256xf32> to vector<8xf32>
    %134 = vector.shape_cast %133 : vector<8xf32> to vector<8x1xf32>
    %cst_40 = arith.constant 3.906250e-03 : f32
    %135 = vector.broadcast %cst_40 : f32 to vector<8x1xf32>
    %136 = arith.mulf %134, %135 : vector<8x1xf32>
    %137 = vector.broadcast %136 : vector<8x1xf32> to vector<8x256xf32>
    %138 = arith.subf %116, %137 : vector<8x256xf32>
    %139 = arith.mulf %138, %138 : vector<8x256xf32>
    %cst_41 = arith.constant dense<0.000000e+00> : vector<8xf32>
    %140 = vector.multi_reduction <add>, %139, %cst_41 [1] : vector<8x256xf32> to vector<8xf32>
    %141 = vector.shape_cast %140 : vector<8xf32> to vector<8x1xf32>
    %cst_42 = arith.constant 3.906250e-03 : f32
    %142 = vector.broadcast %cst_42 : f32 to vector<8x1xf32>
    %143 = arith.mulf %141, %142 : vector<8x1xf32>
    %cst_43 = arith.constant 9.99999974E-6 : f32
    %144 = vector.broadcast %cst_43 : f32 to vector<8x1xf32>
    %145 = arith.addf %143, %144 : vector<8x1xf32>
    %146 = math.rsqrt %145 : vector<8x1xf32>
    %147 = vector.broadcast %146 : vector<8x1xf32> to vector<8x256xf32>
    %148 = arith.mulf %138, %147 : vector<8x256xf32>
    %cst_44 = arith.constant 0.000000e+00 : f32
    %149 = vector.broadcast %cst_44 : f32 to vector<8x256xf32>
    %150 = arith.maximumf %132, %149 : vector<8x256xf32>
    %cst_45 = arith.constant 0.000000e+00 : f32
    %151 = vector.broadcast %cst_45 : f32 to vector<8x256xf32>
    %152 = arith.maximumf %148, %151 : vector<8x256xf32>
    %153 = vector.extract_strided_slice %109 {offsets = [0, 0], sizes = [16, 8], strides = [1, 1]} : vector<16x16xbf16> to vector<16x8xbf16>
    %154 = arith.truncf %150 : vector<8x256xf32> to vector<8x256xbf16>
    %cst_46 = arith.constant dense<0.000000e+00> : vector<16x256xf32>
    %155 = tpu.matmul %153, %154, %cst_46 {dimension_numbers = #tpu.dot_dimension_numbers<[1], [0], [0], [1], [0, 0, 1, 1], [], []>} : vector<16x8xbf16>, vector<8x256xbf16>, vector<16x256xf32> -> vector<16x256xf32>
    %156 = vector.extract_strided_slice %109 {offsets = [0, 8], sizes = [16, 8], strides = [1, 1]} : vector<16x16xbf16> to vector<16x8xbf16>
    %157 = arith.truncf %152 : vector<8x256xf32> to vector<8x256xbf16>
    %cst_47 = arith.constant dense<0.000000e+00> : vector<16x256xf32>
    %158 = tpu.matmul %156, %157, %cst_47 {dimension_numbers = #tpu.dot_dimension_numbers<[1], [0], [0], [1], [0, 0, 1, 1], [], []>} : vector<16x8xbf16>, vector<8x256xbf16>, vector<16x256xf32> -> vector<16x256xf32>
    %159 = arith.addf %155, %158 : vector<16x256xf32>
    %160 = vector.broadcast %110 : vector<16x1xf32> to vector<16x256xf32>
    %161 = arith.addf %159, %160 : vector<16x256xf32>
    %cst_48 = arith.constant dense<0.000000e+00> : vector<16xf32>
    %162 = vector.multi_reduction <add>, %161, %cst_48 [1] : vector<16x256xf32> to vector<16xf32>
    %163 = vector.shape_cast %162 : vector<16xf32> to vector<16x1xf32>
    %cst_49 = arith.constant 3.906250e-03 : f32
    %164 = vector.broadcast %cst_49 : f32 to vector<16x1xf32>
    %165 = arith.mulf %163, %164 : vector<16x1xf32>
    %166 = vector.broadcast %165 : vector<16x1xf32> to vector<16x256xf32>
    %167 = arith.subf %161, %166 : vector<16x256xf32>
    %168 = arith.mulf %167, %167 : vector<16x256xf32>
    %cst_50 = arith.constant dense<0.000000e+00> : vector<16xf32>
    %169 = vector.multi_reduction <add>, %168, %cst_50 [1] : vector<16x256xf32> to vector<16xf32>
    %170 = vector.shape_cast %169 : vector<16xf32> to vector<16x1xf32>
    %cst_51 = arith.constant 3.906250e-03 : f32
    %171 = vector.broadcast %cst_51 : f32 to vector<16x1xf32>
    %172 = arith.mulf %170, %171 : vector<16x1xf32>
    %cst_52 = arith.constant 9.99999974E-6 : f32
    %173 = vector.broadcast %cst_52 : f32 to vector<16x1xf32>
    %174 = arith.addf %172, %173 : vector<16x1xf32>
    %175 = math.rsqrt %174 : vector<16x1xf32>
    %176 = vector.broadcast %175 : vector<16x1xf32> to vector<16x256xf32>
    %177 = arith.mulf %167, %176 : vector<16x256xf32>
    %cst_53 = arith.constant 0.000000e+00 : f32
    %178 = vector.broadcast %cst_53 : f32 to vector<16x256xf32>
    %179 = arith.maximumf %177, %178 : vector<16x256xf32>
    %180 = arith.truncf %179 : vector<16x256xf32> to vector<16x256xbf16>
    %cst_54 = arith.constant dense<0.000000e+00> : vector<72x256xf32>
    %181 = tpu.matmul %111, %180, %cst_54 {dimension_numbers = #tpu.dot_dimension_numbers<[1], [0], [0], [1], [0, 0, 1, 1], [], []>} : vector<72x16xbf16>, vector<16x256xbf16>, vector<72x256xf32> -> vector<72x256xf32>
    %c2_i32 = arith.constant 2 : i32
    %182 = vector.broadcast %c2_i32 : i32 to vector<1x256xi32>
    %183 = arith.cmpi sge, %6, %182 : vector<1x256xi32>
    %184 = arith.extui %183 : vector<1x256xi1> to vector<1x256xi32>
    %185 = arith.sitofp %184 : vector<1x256xi32> to vector<1x256xf32>
    %c14_i32 = arith.constant 14 : i32
    %186 = vector.broadcast %c14_i32 : i32 to vector<1x256xi32>
    %187 = arith.cmpi slt, %6, %186 : vector<1x256xi32>
    %188 = arith.extui %187 : vector<1x256xi1> to vector<1x256xi32>
    %189 = arith.sitofp %188 : vector<1x256xi32> to vector<1x256xf32>
    %c2_i32_55 = arith.constant 2 : i32
    %190 = vector.broadcast %c2_i32_55 : i32 to vector<1x256xi32>
    %191 = arith.cmpi sge, %4, %190 : vector<1x256xi32>
    %192 = arith.extui %191 : vector<1x256xi1> to vector<1x256xi32>
    %193 = arith.sitofp %192 : vector<1x256xi32> to vector<1x256xf32>
    %c14_i32_56 = arith.constant 14 : i32
    %194 = vector.broadcast %c14_i32_56 : i32 to vector<1x256xi32>
    %195 = arith.cmpi slt, %4, %194 : vector<1x256xi32>
    %196 = arith.extui %195 : vector<1x256xi1> to vector<1x256xi32>
    %197 = arith.sitofp %196 : vector<1x256xi32> to vector<1x256xf32>
    %198 = vector.extract_strided_slice %181 {offsets = [32, 0], sizes = [8, 256], strides = [1, 1]} : vector<72x256xf32> to vector<8x256xf32>
    %199 = vector.extract_strided_slice %181 {offsets = [0, 0], sizes = [8, 256], strides = [1, 1]} : vector<72x256xf32> to vector<8x256xf32>
    %c34_i32 = arith.constant 34 : i32
    %200 = tpu.dynamic_rotate %199 by %c34_i32 dim 1 : vector<8x256xf32>, i32 -> vector<8x256xf32>
    %201 = vector.broadcast %185 : vector<1x256xf32> to vector<8x256xf32>
    %202 = arith.mulf %200, %201 : vector<8x256xf32>
    %203 = vector.broadcast %193 : vector<1x256xf32> to vector<8x256xf32>
    %204 = arith.mulf %202, %203 : vector<8x256xf32>
    %205 = arith.addf %198, %204 : vector<8x256xf32>
    %206 = vector.extract_strided_slice %181 {offsets = [8, 0], sizes = [8, 256], strides = [1, 1]} : vector<72x256xf32> to vector<8x256xf32>
    %c32_i32 = arith.constant 32 : i32
    %207 = tpu.dynamic_rotate %206 by %c32_i32 dim 1 : vector<8x256xf32>, i32 -> vector<8x256xf32>
    %208 = vector.broadcast %193 : vector<1x256xf32> to vector<8x256xf32>
    %209 = arith.mulf %207, %208 : vector<8x256xf32>
    %210 = arith.addf %205, %209 : vector<8x256xf32>
    %211 = vector.extract_strided_slice %181 {offsets = [16, 0], sizes = [8, 256], strides = [1, 1]} : vector<72x256xf32> to vector<8x256xf32>
    %c30_i32 = arith.constant 30 : i32
    %212 = tpu.dynamic_rotate %211 by %c30_i32 dim 1 : vector<8x256xf32>, i32 -> vector<8x256xf32>
    %213 = vector.broadcast %189 : vector<1x256xf32> to vector<8x256xf32>
    %214 = arith.mulf %212, %213 : vector<8x256xf32>
    %215 = vector.broadcast %193 : vector<1x256xf32> to vector<8x256xf32>
    %216 = arith.mulf %214, %215 : vector<8x256xf32>
    %217 = arith.addf %210, %216 : vector<8x256xf32>
    %218 = vector.extract_strided_slice %181 {offsets = [24, 0], sizes = [8, 256], strides = [1, 1]} : vector<72x256xf32> to vector<8x256xf32>
    %c2_i32_57 = arith.constant 2 : i32
    %219 = tpu.dynamic_rotate %218 by %c2_i32_57 dim 1 : vector<8x256xf32>, i32 -> vector<8x256xf32>
    %220 = vector.broadcast %185 : vector<1x256xf32> to vector<8x256xf32>
    %221 = arith.mulf %219, %220 : vector<8x256xf32>
    %222 = arith.addf %217, %221 : vector<8x256xf32>
    %223 = vector.extract_strided_slice %181 {offsets = [40, 0], sizes = [8, 256], strides = [1, 1]} : vector<72x256xf32> to vector<8x256xf32>
    %c254_i32 = arith.constant 254 : i32
    %224 = tpu.dynamic_rotate %223 by %c254_i32 dim 1 : vector<8x256xf32>, i32 -> vector<8x256xf32>
    %225 = vector.broadcast %189 : vector<1x256xf32> to vector<8x256xf32>
    %226 = arith.mulf %224, %225 : vector<8x256xf32>
    %227 = arith.addf %222, %226 : vector<8x256xf32>
    %228 = vector.extract_strided_slice %181 {offsets = [48, 0], sizes = [8, 256], strides = [1, 1]} : vector<72x256xf32> to vector<8x256xf32>
    %c226_i32 = arith.constant 226 : i32
    %229 = tpu.dynamic_rotate %228 by %c226_i32 dim 1 : vector<8x256xf32>, i32 -> vector<8x256xf32>
    %230 = vector.broadcast %185 : vector<1x256xf32> to vector<8x256xf32>
    %231 = arith.mulf %229, %230 : vector<8x256xf32>
    %232 = vector.broadcast %197 : vector<1x256xf32> to vector<8x256xf32>
    %233 = arith.mulf %231, %232 : vector<8x256xf32>
    %234 = arith.addf %227, %233 : vector<8x256xf32>
    %235 = vector.extract_strided_slice %181 {offsets = [56, 0], sizes = [8, 256], strides = [1, 1]} : vector<72x256xf32> to vector<8x256xf32>
    %c224_i32 = arith.constant 224 : i32
    %236 = tpu.dynamic_rotate %235 by %c224_i32 dim 1 : vector<8x256xf32>, i32 -> vector<8x256xf32>
    %237 = vector.broadcast %197 : vector<1x256xf32> to vector<8x256xf32>
    %238 = arith.mulf %236, %237 : vector<8x256xf32>
    %239 = arith.addf %234, %238 : vector<8x256xf32>
    %240 = vector.extract_strided_slice %181 {offsets = [64, 0], sizes = [8, 256], strides = [1, 1]} : vector<72x256xf32> to vector<8x256xf32>
    %c222_i32 = arith.constant 222 : i32
    %241 = tpu.dynamic_rotate %240 by %c222_i32 dim 1 : vector<8x256xf32>, i32 -> vector<8x256xf32>
    %242 = vector.broadcast %189 : vector<1x256xf32> to vector<8x256xf32>
    %243 = arith.mulf %241, %242 : vector<8x256xf32>
    %244 = vector.broadcast %197 : vector<1x256xf32> to vector<8x256xf32>
    %245 = arith.mulf %243, %244 : vector<8x256xf32>
    %246 = arith.addf %239, %245 : vector<8x256xf32>
    %247 = vector.broadcast %112 : vector<8x1xf32> to vector<8x256xf32>
    %248 = arith.addf %246, %247 : vector<8x256xf32>
    %249 = vector.broadcast %1 : vector<1x256xf32> to vector<8x256xf32>
    %250 = arith.mulf %248, %249 : vector<8x256xf32>
    %251 = vector.broadcast %1 : vector<1x256xf32> to vector<8x256xf32>
    %252 = arith.mulf %114, %251 : vector<8x256xf32>
    %253 = vector.broadcast %1 : vector<1x256xf32> to vector<8x256xf32>
    %254 = arith.mulf %116, %253 : vector<8x256xf32>
    %c0_58 = arith.constant 0 : index
    %c0_59 = arith.constant 0 : index
    %255 = vector.load %arg11[%c0_58, %c0_59] : memref<8x24xbf16, #tpu.memory_space<vmem>>, vector<8x24xbf16>
    %256 = vector.extract_strided_slice %255 {offsets = [0, 0], sizes = [8, 8], strides = [1, 1]} : vector<8x24xbf16> to vector<8x8xbf16>
    %257 = arith.truncf %250 : vector<8x256xf32> to vector<8x256xbf16>
    %cst_60 = arith.constant dense<0.000000e+00> : vector<8x256xf32>
    %258 = tpu.matmul %256, %257, %cst_60 {dimension_numbers = #tpu.dot_dimension_numbers<[1], [0], [0], [1], [0, 0, 1, 1], [], []>} : vector<8x8xbf16>, vector<8x256xbf16>, vector<8x256xf32> -> vector<8x256xf32>
    %259 = vector.extract_strided_slice %255 {offsets = [0, 8], sizes = [8, 8], strides = [1, 1]} : vector<8x24xbf16> to vector<8x8xbf16>
    %260 = arith.truncf %252 : vector<8x256xf32> to vector<8x256xbf16>
    %cst_61 = arith.constant dense<0.000000e+00> : vector<8x256xf32>
    %261 = tpu.matmul %259, %260, %cst_61 {dimension_numbers = #tpu.dot_dimension_numbers<[1], [0], [0], [1], [0, 0, 1, 1], [], []>} : vector<8x8xbf16>, vector<8x256xbf16>, vector<8x256xf32> -> vector<8x256xf32>
    %262 = arith.addf %258, %261 : vector<8x256xf32>
    %263 = vector.extract_strided_slice %255 {offsets = [0, 16], sizes = [8, 8], strides = [1, 1]} : vector<8x24xbf16> to vector<8x8xbf16>
    %264 = arith.truncf %254 : vector<8x256xf32> to vector<8x256xbf16>
    %cst_62 = arith.constant dense<0.000000e+00> : vector<8x256xf32>
    %265 = tpu.matmul %263, %264, %cst_62 {dimension_numbers = #tpu.dot_dimension_numbers<[1], [0], [0], [1], [0, 0, 1, 1], [], []>} : vector<8x8xbf16>, vector<8x256xbf16>, vector<8x256xf32> -> vector<8x256xf32>
    %266 = arith.addf %262, %265 : vector<8x256xf32>
    %c0_63 = arith.constant 0 : index
    %c0_64 = arith.constant 0 : index
    %267 = vector.load %arg12[%c0_63, %c0_64] : memref<8x1xf32, #tpu.memory_space<vmem>>, vector<8x1xf32>
    %268 = vector.broadcast %267 : vector<8x1xf32> to vector<8x256xf32>
    %269 = arith.addf %266, %268 : vector<8x256xf32>
    %c0_65 = arith.constant 0 : index
    %c0_66 = arith.constant 0 : index
    %c0_67 = arith.constant 0 : index
    %270 = vector.load %arg13[%c0_65, %c0_66, %c0_67] : memref<1x8x256xf32, #tpu.memory_space<vmem>>, vector<1x8x256xf32>
    %271 = vector.shape_cast %270 : vector<1x8x256xf32> to vector<8x256xf32>
    %272 = vector.shape_cast %269 : vector<8x256xf32> to vector<1x8x256xf32>
    tpu.vector_store %arg13[%c0_65, %c0_66, %c0_67], %272 {strides = array<i32>} : memref<1x8x256xf32, #tpu.memory_space<vmem>>, vector<1x8x256xf32>,
    return
  }
  func.func @transform_0(%arg0: i32) -> (i32, i32, i32) {
    %c0_i32 = arith.constant 0 : i32
    %c0_i32_0 = arith.constant 0 : i32
    %c0_i32_1 = arith.constant 0 : i32
    return %arg0, %c0_i32, %c0_i32_0 : i32, i32, i32
  }
  func.func @transform_1(%arg0: i32) -> (i32, i32, i32) {
    %c0_i32 = arith.constant 0 : i32
    %c0_i32_0 = arith.constant 0 : i32
    %c0_i32_1 = arith.constant 0 : i32
    return %arg0, %c0_i32, %c0_i32_0 : i32, i32, i32
  }
  func.func @transform_2(%arg0: i32) -> (i32, i32) {
    %c0_i32 = arith.constant 0 : i32
    %c0_i32_0 = arith.constant 0 : i32
    %c0_i32_1 = arith.constant 0 : i32
    return %c0_i32, %c0_i32_0 : i32, i32
  }
  func.func @transform_3(%arg0: i32) -> (i32, i32) {
    %c0_i32 = arith.constant 0 : i32
    %c0_i32_0 = arith.constant 0 : i32
    %c0_i32_1 = arith.constant 0 : i32
    return %c0_i32, %c0_i32_0 : i32, i32
  }
  func.func @transform_4(%arg0: i32) -> (i32, i32) {
    %c0_i32 = arith.constant 0 : i32
    %c0_i32_0 = arith.constant 0 : i32
    %c0_i32_1 = arith.constant 0 : i32
    return %c0_i32, %c0_i32_0 : i32, i32
  }
  func.func @transform_5(%arg0: i32) -> (i32, i32) {
    %c0_i32 = arith.constant 0 : i32
    %c0_i32_0 = arith.constant 0 : i32
    %c0_i32_1 = arith.constant 0 : i32
    return %c0_i32, %c0_i32_0 : i32, i32
  }
  func.func @transform_6(%arg0: i32) -> (i32, i32) {
    %c0_i32 = arith.constant 0 : i32
    %c0_i32_0 = arith.constant 0 : i32
    %c0_i32_1 = arith.constant 0 : i32
    return %c0_i32, %c0_i32_0 : i32, i32
  }
  func.func @transform_7(%arg0: i32) -> (i32, i32) {
    %c0_i32 = arith.constant 0 : i32
    %c0_i32_0 = arith.constant 0 : i32
    %c0_i32_1 = arith.constant 0 : i32
    return %c0_i32, %c0_i32_0 : i32, i32
  }
  func.func @transform_8(%arg0: i32) -> (i32, i32) {
    %c0_i32 = arith.constant 0 : i32
    %c0_i32_0 = arith.constant 0 : i32
    %c0_i32_1 = arith.constant 0 : i32
    return %c0_i32, %c0_i32_0 : i32, i32
  }
  func.func @transform_9(%arg0: i32) -> (i32, i32) {
    %c0_i32 = arith.constant 0 : i32
    %c0_i32_0 = arith.constant 0 : i32
    %c0_i32_1 = arith.constant 0 : i32
    return %c0_i32, %c0_i32_0 : i32, i32
  }
  func.func @transform_10(%arg0: i32) -> (i32, i32) {
    %c0_i32 = arith.constant 0 : i32
    %c0_i32_0 = arith.constant 0 : i32
    %c0_i32_1 = arith.constant 0 : i32
    return %c0_i32, %c0_i32_0 : i32, i32
  }
  func.func @transform_11(%arg0: i32) -> (i32, i32) {
    %c0_i32 = arith.constant 0 : i32
    %c0_i32_0 = arith.constant 0 : i32
    %c0_i32_1 = arith.constant 0 : i32
    return %c0_i32, %c0_i32_0 : i32, i32
  }
  func.func @transform_12(%arg0: i32) -> (i32, i32, i32) {
    %c0_i32 = arith.constant 0 : i32
    %c0_i32_0 = arith.constant 0 : i32
    %c0_i32_1 = arith.constant 0 : i32
    return %arg0, %c0_i32, %c0_i32_0 : i32, i32, i32
  }
}

</mosaic_0001>

<bundles_post_ra>
// kernel: tpu_custom_call.1
= control target key start
LH: loop header
LB: loop body
LE: loop exit
PB: predicated region body
PF: predicated region fallthrough
CT: control target
= control target key end

     0   :  { %17 = vsyncpa [#allocation3], 0  ;;  %s2194_s0 = inlined_call_operand.vmem [shape: bf16[2,8,256], index: 0, kind: input, shape index: {}]   ;;  %s2195_s1 = inlined_call_operand.vmem [shape: f32[2,1,256], index: 1, kind: input, shape index: {}]   ;;  %s2196_s2 = inlined_call_operand.vmem [shape: bf16[16,8], index: 2, kind: input, shape index: {}]   ;;  %s2197_s3 = inlined_call_operand.vmem [shape: f32[16,1], index: 3, kind: input, shape index: {}]   ;;  %s2198_s4 = inlined_call_operand.vmem [shape: bf16[72,16], index: 4, kind: input, shape index: {}]   ;;  %s2199_s5 = inlined_call_operand.vmem [shape: f32[8,1], index: 5, kind: input, shape index: {}]   ;;  %s2200_s6 = inlined_call_operand.vmem [shape: bf16[16,16], index: 6, kind: input, shape index: {}]   ;;  %s2201_s7 = inlined_call_operand.vmem [shape: f32[16,1], index: 7, kind: input, shape index: {}]   ;;  %s2202_s8 = inlined_call_operand.vmem [shape: bf16[72,16], index: 8, kind: input, shape index: {}]   ;;  %s2203_s9 = inlined_call_operand.vmem [shape: f32[8,1], index: 9, kind: input, shape index: {}]   ;;  %s2204_s10 = inlined_call_operand.vmem [shape: bf16[8,24], index: 10, kind: input, shape index: {}]   ;;  %s2205_s11 = inlined_call_operand.vmem [shape: f32[8,1], index: 11, kind: input, shape index: {}]   ;;  %s2206_s12 = inlined_call_operand.hbm [shape: f32[2,8,256], index: 12, kind: output, shape index: {}]  }
   0x1   :  { %19 = vsyncpa [#allocation3 + $0x1], 0  ;;  %s1859_s21 = smov 0   ;;  %s1861_s22 = smov 0  }
   0x2   :  { %s1863_s23 = smov 0   ;;  %s1865_s24 = smov 0  }
   0x3 LB: > { %2208 = sst [smem:[#allocation5_spill]] %s1768_s23  ;;  %s1880_s25 = sadd.s32 4294967295, %s1772_s24   ;;  %s1772_s24 = sphi %s1865_s24, %s2216_s24   ;;  %s1768_s23 = sphi %s1863_s23, %s2213_s23   ;;  %s1764_s22 = sphi %s1861_s22, %s2215_s22   ;;  %s1760_s21 = sphi %s1859_s21, %s2214_s21  }
   0x4   : > { %s1561_s26 = sadd.s32 4294967294, %s1772_s24   ;;  %s1884_s27 = sadd.s32 1, %s1772_s24  }
   0x5   : > { %s294_s28 = sadd.s32 1, %s1768_s23  ;;  %s291_s29 = ssub.s32 %s1772_s24, %s1884_s27 }
   0x6   : > { %p304_p0 = scmp.ne.s32.totalorder %s1768_s23, %s1764_s22  ;;  %p292_p1 = scmp.eq.s32.totalorder %s291_s29, 0 }
   0x7   : > { %p305_p2 = scmp.eq.s32.totalorder %s1880_s25, 1  ;;  %p310_p3 = scmp.ne.s32.totalorder %s1764_s22, %s1760_s21 }
   0x8   : > { %p311_p4 = scmp.eq.s32.totalorder %s1561_s26, 1  ;;  %p1564_p7 = scmp.ge.s32.totalorder %s1772_s24, 1 }
   0x9   : > { %s1895_s30 = scalar_select %p292_p1, %s1768_s23, %s294_s28  }
   0xa   : > { %p1897_p5 = por %p305_p2, %p304_p0  ;;  %p1901_p6 = por %p311_p4, %p310_p3 }
   0xb   : > { %2209 = sst [smem:[#allocation6_spill]] %s1895_s30  ;;  %p374_p8 = scmp.lt.s32.totalorder %s1772_s24, 3 }
   0xd   : > { %p375_p9 = pnand %p1564_p7, %p374_p8 }
   0xe   : > { %p420_p10 = scmp.lt.s32.totalorder (!%p375_p9), %s1880_s25, 1  ;;  %s1775_s30 = smov (!%p375_p9), 17  }
   0xf   : > { %378 = sbr.rel (%p375_p9) target bundleno = 2330 (0x91a), region = 68  ;;  %s1777_s18 = smov (!%p375_p9), 15  }
  0x10   : > { %s1778_s19 = smov (!%p375_p9), 1   ;;  %s1781_s28 = smov (!%p375_p9), 112  }
  0x11   : > { %s1782_s29 = smov (!%p375_p9), 111   ;;  %s1786_s16 = smov (!%p375_p9), 32  }
  0x14   : > { %v431_v0 = vlaneseq  ;;  %v1774_v1 = vmov 0   ;;  %v443_v2 = vld [vmem:[%s2197_s3] sm:$0xff]  ;;  %s421_s17 = scalar_select %p420_p10, %s1880_s25, 1  ;;  %v444_v4 = vld [vmem:[%s2197_s3 + $0x8] sm:$0xff]  ;;  %vm491_vm0 = vcmask 1043456   ;;  %vm487_vm1 = vcmask 64512  }
  0x15   : > { %530 = vmatprep.mubr.bf16.mxu0 %v1774_v1  ;;  %1685 = vset.pattern.permute.xlu0 %v1774_v1  ;;  %v1687_v20 = vld [vmem:[%s2196_s2] sm:$0xff]   ;;  %vm602_vm2 = vcmask 130048  }
  0x16   : > { %v457_v3 = vshrl.u32 %v431_v0, 7  ;;  %474 = vperm.xlu0 %1685, %v443_v2   ;;  %650 = vmatprep.mubr.bf16.mxu1 %v1774_v1  ;;  %s1625_s20 = sshll.u32 %s421_s17, 3  ;;  %s1568_s26 = sshll.u32 %s421_s17, 1 }
  0x17   : > { %1686 = vset.pattern.permute.xlu1 %v1774_v1  ;;  %s424_s15 = scalar_lea.vmem %s2194_s0, %s1625_s20  ;;  %s428_s23 = scalar_lea.vmem %s2195_s1, %s1568_s26 }
  0x18   : > { %v458_v5 = vsub.s32 0, %v457_v3  ;;  %v462_v6 = vsub.s32 1, %v457_v3  ;;  %v430_v7 = vld [vmem:[%s428_s23] sm:$0x3]  ;;  %s1776_s17 = smov 16   ;;  %s1779_s20 = smov 113  }
  0x19   : > { %v438_v8 = vld [vmem:[%s424_s15] sm:$0xff]  ;;  %s1780_s26 = smov 127   ;;  %s1785_s15 = smov 34  }
  0x1a   : > { %479 = vperm.xlu0 %1685, %v444_v4   ;;  %v440_v9 = vunpack.c.h.bf16 %v438_v8  ;;  %v1926_v10 = vrot.slane %v430_v7, %v458_v5  ;;  %v1928_v11 = vrot.slane %v430_v7, %v462_v6  ;;  %v439_v12 = vunpack.c.l.bf16 %v438_v8  ;;  %v1688_v3 = vld [vmem:[%s2198_s4] sm:$0xff]   ;;  %v1689_v4 = vld [vmem:[%s2198_s4 + $0x8] sm:$0xff]   ;;  %v1690_v5 = vld [vmem:[%s2198_s4 + $0x10] sm:$0xff]   ;;  %s1787_s23 = smov 30  }
  0x1b   : > { %v1691_v6 = vld [vmem:[%s2198_s4 + $0x18] sm:$0xff]   ;;  %v1692_v7 = vld [vmem:[%s2198_s4 + $0x20] ss:$0 sps:$4 sm:$0xff]  }
  0x1c   : > { %v1931_v13 = vmul.f32 %v1928_v11, %v440_v9  ;;  %v1934_v14 = vmul.f32 %v1926_v10, %v439_v12 }
  0x1e   : > { %v469_v15 = vmax.f32 %v1931_v13, 0.0  ;;  %v468_v16 = vmax.f32 %v1934_v14, 0.0 }
  0x20   : > { %v471_v17 = vpack.c.bf16 %v469_v15, %v469_v15  ;;  %v470_v18 = vpack.c.bf16 %v468_v16, %v468_v16 }
  0x22   : > { %1570 = vmatprep.subr.msk.bf16.mxu0 %vm491_vm0, %v471_v17  ;;  %v493_v19 = vsel %vm491_vm0, %v470_v18, 0 }
  0x23   : > { %513 = vmatpush1.bf16.msra.mxu0 %v493_v19 }
  0x26   : > { %1571 = vmatmul.mubr.msk.bf16.vlgmr.msra.gmra.mxu0 %vm487_vm1, %v1687_v20 }
  0x27   : > { %932 = vmatprep.mubr.bf16.mxu0 %v1774_v1 }
  0x91   : > { %v475_v21 = vpop.permute.xlu0 %474 }
  0x95   : > { %v480_v28 = vpop.permute.xlu0 %479 }
  0xe6   : > { %v532_v22 = vpop.f32.mrf.mxu0 }
  0xe7   : > { %v533_v24 = vadd.f32 %v532_v22, %v475_v21 }
  0xe8   : > { %v534_v23 = vpop.f32.mrf.mxu0 }
  0xe9   : > { %v535_v25 = vadd.f32 %v534_v23, %v475_v21 }
  0xea   : > { %v536_v26 = vpop.f32.mrf.mxu0 }
  0xeb   : > { %v541_v27 = vadd.f32 %v535_v25, %v533_v24  ;;  %v537_v30 = vadd.f32 %v536_v26, %v480_v28 }
  0xec   : > { %v538_v29 = vpop.f32.mrf.mxu0 }
  0xed   : > { %v539_v31 = vadd.f32 %v538_v29, %v480_v28  ;;  %542 = vadd.xlane.f32.xlu1 %v541_v27 }
  0xef   : > { %v544_v32 = vadd.f32 %v539_v31, %v537_v30 }
  0xf1   : > { %545 = vadd.xlane.f32.xlu1 %v544_v32 }
 0x176   : > { %v543_v33 = vpop.xlane.xlu1 %542 }
 0x177   : > { %v547_v34 = vmul.f32 0.00390625, %v543_v33  ;;  %v1981_v33 = vmul.f32 %v1934_v14, %v1926_v10 }
 0x179   : > { %v549_v35 = vsub.f32 %v533_v24, %v547_v34  ;;  %v550_v36 = vsub.f32 %v535_v25, %v547_v34  ;;  %v1985_v34 = vmul.f32 %v1931_v13, %v1928_v11 }
 0x17a   : > { %v546_v37 = vpop.xlane.xlu1 %545 }
 0x17b   : > { %v548_v38 = vmul.f32 0.00390625, %v546_v37  ;;  %v553_v39 = vmul.f32 %v549_v35, %v549_v35  ;;  %v554_v40 = vmul.f32 %v550_v36, %v550_v36 }
 0x17d   : > { %v551_v41 = vsub.f32 %v537_v30, %v548_v38  ;;  %v552_v42 = vsub.f32 %v539_v31, %v548_v38  ;;  %v557_v43 = vadd.f32 %v554_v40, %v553_v39  ;;  %v454_v30 = vld [vmem:[%s2199_s5] sm:$0xff]  ;;  %v1990_v38 = vand.u32 127, %v431_v0 }
 0x17f   : > { %558 = vadd.xlane.f32.xlu0 %v557_v43  ;;  %v555_v44 = vmul.f32 %v551_v41, %v551_v41  ;;  %v556_v45 = vmul.f32 %v552_v42, %v552_v42  ;;  %v433_v40 = vadd.s32 128, %v1990_v38  ;;  %v1994_v14 = vand.u32 15, %v1990_v38 }
 0x180   : > { %v1999_v43 = vshra.s32 %v1990_v38, 4  ;;  %vm727_vm5 = vcmp.lt.s32.totalorder %v1990_v38, 17  ;;  %vm751_vm10 = vcmp.lt.s32.totalorder %v1990_v38, 15  ;;  %vm740_vm11 = vcmp.lt.s32.totalorder %v1990_v38, 16 }
 0x181   : > { %v560_v46 = vadd.f32 %v556_v45, %v555_v44  ;;  %v2001_v44 = vshra.s32 %v433_v40, 4  ;;  %vm699_vm3 = vcmp.ge.s32.totalorder %v1994_v14, 1  ;;  %v1783_v45 = vmov 0.0  }
 0x182   : > { %vm711_vm6 = vcmp.ge.s32.totalorder %v1999_v43, 1  ;;  %vm705_vm8 = vcmp.lt.s32.totalorder %v1994_v14, 15  ;;  %vm764_vm12 = vcmp.lt.s32.totalorder %v1990_v38, 1  ;;  %vm717_vm13 = vcmp.lt.s32.totalorder %v1999_v43, 15 }
 0x183   : > { %561 = vadd.xlane.f32.xlu1 %v560_v46  ;;  %v1582_v46 = vsel %vm699_vm3, 1.0, %v1783_v45  ;;  %vm712_vm7 = vcmp.ge.s32.totalorder %v2001_v44, 1  ;;  %vm775_vm14 = vcmp.lt.s32.totalorder %v1990_v38, 127  ;;  %vm718_vm15 = vcmp.lt.s32.totalorder %v2001_v44, 15 }
 0x184   : > { %vm786_vm3 = vcmp.lt.s32.totalorder %v1990_v38, 113 }
 0x208   : > { %v559_v47 = vpop.xlane.xlu0 %558 }
 0x209   : > { %v563_v48 = vmul.f32 0.00390625, %v559_v47 }
 0x20b   : > { %v565_v49 = vadd.f32 1e-05, %v563_v48 }
 0x20c   : > { %v562_v50 = vpop.xlane.xlu1 %561 }
 0x20d   : > { %1700 = vrsqrt.f32 %v565_v49  ;;  %v564_v51 = vmul.f32 0.00390625, %v562_v50 }
 0x20f   : > { %v566_v52 = vadd.f32 1e-05, %v564_v51 }
 0x211   : > { %1702 = vrsqrt.f32 %v566_v52 }
 0x21a   : > { %v1701_v53 = vpop.eup %1700 }
 0x21b   : > { %v570_v54 = vmul.f32 %v1701_v53, %v550_v36  ;;  %v569_v55 = vmul.f32 %v1701_v53, %v549_v35  ;;  %v860_v35 = vadd.f32 %v1985_v34, %v1981_v33  ;;  %v1586_v53 = vsel %vm711_vm6, 1.0, %v1783_v45 }
 0x21d   : > { %v574_v59 = vmax.f32 %v570_v54, 0.0  ;;  %v573_v61 = vmax.f32 %v569_v55, 0.0  ;;  %v1587_v54 = vsel %vm712_vm7, 1.0, %v1783_v45  ;;  %vm1194_vm7 = vcmp.lt.s32.totalorder %v1990_v38, 34 }
 0x21e   : > { %v1703_v56 = vpop.eup %1702 }
 0x21f   : > { %v572_v57 = vmul.f32 %v1703_v56, %v552_v42  ;;  %v571_v58 = vmul.f32 %v1703_v56, %v551_v41  ;;  %v1996_v42 = vand.u32 15, %v433_v40  ;;  %v2017_v56 = vsel %vm705_vm8, 1.0, %v1783_v45 }
 0x220   : > { %vm1178_vm8 = vcmp.ge.s32.totalorder %v1999_v43, 2 }
 0x221   : > { %v576_v60 = vmax.f32 %v572_v57, 0.0  ;;  %v575_v62 = vmax.f32 %v571_v58, 0.0  ;;  %vm700_vm4 = vcmp.ge.s32.totalorder %v1996_v42, 1  ;;  %vm706_vm9 = vcmp.lt.s32.totalorder %v1996_v42, 15 }
 0x222   : > { %v1583_v47 = vsel %vm700_vm4, 1.0, %v1783_v45  ;;  %v2020_v57 = vsel %vm706_vm9, 1.0, %v1783_v45  ;;  %vm799_vm4 = vcmp.lt.s32.totalorder %v1990_v38, 112  ;;  %vm1167_vm6 = vcmp.ge.s32.totalorder %v1996_v42, 2 }
 0x223   : > { %v578_v63 = vpack.c.bf16 %v576_v60, %v574_v59  ;;  %v577_v2 = vpack.c.bf16 %v575_v62, %v573_v61  ;;  %vm1179_vm9 = vcmp.ge.s32.totalorder %v2001_v44, 2 }
 0x225   : > { %632 = vmatprep.subr.bf16.mxu1 %v578_v63 }
 0x226   : > { %633 = vmatpush1.bf16.msra.mxu1 %v577_v2 }
 0x229   : > { %1577 = vmatmul.mubr.msk.bf16.vlgmr.msra.gmra.mxu1 %vm602_vm2, %v1688_v3 }
 0x22a   : > { %660 = vmatprep.mubr.bf16.mxu1 %v1774_v1 }
 0x231   : > { %1578 = vmatmul.mubr.msk.bf16.gmra.mxu1 %vm602_vm2, %v1689_v4 }
 0x232   : > { %670 = vmatprep.mubr.bf16.mxu1 %v1774_v1 }
 0x239   : > { %1579 = vmatmul.mubr.msk.bf16.gmra.mxu1 %vm602_vm2, %v1690_v5 }
 0x23a   : > { %680 = vmatprep.mubr.bf16.mxu1 %v1774_v1 }
 0x241   : > { %1580 = vmatmul.mubr.msk.bf16.gmra.mxu1 %vm602_vm2, %v1691_v6 }
 0x242   : > { %690 = vmatprep.mubr.bf16.mxu1 %v1774_v1 }
 0x249   : > { %1581 = vmatmul.mubr.msk.bf16.gmra.mxu1 %vm602_vm2, %v1692_v7 }
 0x24a   : > { %1350 = vmatprep.mubr.bf16.mxu1 %v1774_v1 }
 0x2e9   : > { %v652_v8 = vpop.f32.mrf.mxu1 }
 0x2ea   : > { %723 = vrot.lane.b32.xlu1 %v652_v8, %s1775_s30 }
 0x2eb   : > { %v654_v9 = vpop.f32.mrf.mxu1 }
 0x2ed   : > { %v656_v12 = vpop.f32.mrf.mxu1 }
 0x2ee   : > { %725 = vrot.lane.b32.xlu1 %v654_v9, %s1775_s30  ;;  %s1788_s30 = smov 2  }
 0x2ef   : > { %v658_v15 = vpop.f32.mrf.mxu1 }
 0x2f1   : > { %v662_v16 = vpop.f32.mrf.mxu1 }
 0x2f2   : > { %736 = vrot.lane.b32.xlu1 %v656_v12, %s1776_s17  ;;  %747 = vrot.lane.b32.xlu0 %v662_v16, %s1777_s18 }
 0x2f3   : > { %v664_v17 = vpop.f32.mrf.mxu1 }
 0x2f5   : > { %v666_v18 = vpop.f32.mrf.mxu1 }
 0x2f6   : > { %738 = vrot.lane.b32.xlu1 %v658_v15, %s1776_s17  ;;  %s1784_s17 = smov 120  }
 0x2f7   : > { %v668_v19 = vpop.f32.mrf.mxu1 }
 0x2f9   : > { %v1970_v20 = vpop.f32.mrf.mxu1 }
 0x2fa   : > { %749 = vrot.lane.b32.xlu1 %v664_v17, %s1777_s18  ;;  %s1789_s18 = smov 126  }
 0x2fb   : > { %v1972_v21 = vpop.f32.mrf.mxu1 }
 0x2fd   : > { %v676_v22 = vpop.f32.mrf.mxu1 }
 0x2fe   : > { %760 = vrot.lane.b32.xlu1 %v666_v18, %s1778_s19 }
 0x2ff   : > { %v678_v23 = vpop.f32.mrf.mxu1 }
 0x301   : > { %v682_v24 = vpop.f32.mrf.mxu1 }
 0x302   : > { %762 = vrot.lane.b32.xlu1 %v668_v19, %s1778_s19  ;;  %782 = vrot.lane.b32.xlu0 %v682_v24, %s1779_s20  ;;  %v1588_v19 = vsel %vm717_vm13, 1.0, %v1783_v45  ;;  %s1790_s19 = smov 98   ;;  %vm1207_vm13 = vcmp.lt.s32.totalorder %v1990_v38, 32 }
 0x303   : > { %v684_v25 = vpop.f32.mrf.mxu1 }
 0x305   : > { %v686_v26 = vpop.f32.mrf.mxu1 }
 0x306   : > { %771 = vrot.lane.b32.xlu1 %v676_v22, %s1780_s26  ;;  %795 = vrot.lane.b32.xlu0 %v686_v26, %s1781_s28  ;;  %v1589_v26 = vsel %vm718_vm15, 1.0, %v1783_v45  ;;  %vm1253_vm15 = vcmp.lt.s32.totalorder %v1990_v38, 98 }
 0x307   : > { %v688_v27 = vpop.f32.mrf.mxu1 }
 0x309   : > { %v692_v28 = vpop.f32.mrf.mxu1 }
 0x30a   : > { %773 = vrot.lane.b32.xlu1 %v678_v23, %s1780_s26  ;;  %806 = vrot.lane.b32.xlu0 %v692_v28, %s1782_s29 }
 0x30b   : > { %v694_v29 = vpop.f32.mrf.mxu1 }
 0x30d   : > { %v696_v31 = vpop.f32.mrf.mxu1 }
 0x30e   : > { %784 = vrot.lane.b32.xlu1 %v684_v25, %s1779_s20  ;;  %821 = vperm.xlu0 %1685, %v454_v30   ;;  %s1791_s20 = smov 96  }
 0x30f   : > { %v697_v32 = vpop.f32.mrf.mxu1 }
 0x312   : > { %797 = vrot.lane.b32.xlu1 %v688_v27, %s1781_s28 }
 0x316   : > { %808 = vrot.lane.b32.xlu1 %v694_v29, %s1782_s29 }
 0x33a   : > { %861 = vadd.xlane.f32.xlu1 %v860_v35 }
 0x35c   : > { %v724_v36 = vpop.permute.xlu1 %723 }
 0x360   : > { %v726_v37 = vpop.permute.xlu1 %725 }
 0x361   : > { %v728_v48 = vsel %vm727_vm5, %v724_v36, %v726_v37  ;;  %v729_v49 = vsel %vm727_vm5, %v726_v37, %v724_v36  ;;  %vm810_vm5 = vcmp.lt.s32.totalorder %v1990_v38, 111 }
 0x362   : > { %v730_v50 = vmul.f32 %v1582_v46, %v729_v49  ;;  %v731_v51 = vmul.f32 %v1583_v47, %v728_v48 }
 0x364   : > { %v737_v39 = vpop.permute.xlu1 %736  ;;  %v748_v55 = vpop.permute.xlu0 %747  ;;  %v732_v60 = vmul.f32 %v1586_v53, %v730_v50  ;;  %v733_v61 = vmul.f32 %v1587_v54, %v731_v51 }
 0x366   : > { %v734_v7 = vadd.f32 %v732_v60, %v1970_v20  ;;  %v735_v8 = vadd.f32 %v733_v61, %v1972_v21 }
 0x368   : > { %v739_v41 = vpop.permute.xlu1 %738 }
 0x369   : > { %v741_v62 = vsel %vm740_vm11, %v737_v39, %v739_v41  ;;  %v742_v63 = vsel %vm740_vm11, %v739_v41, %v737_v39  ;;  %vm1173_vm11 = vcmp.lt.s32.totalorder %v1996_v42, 14 }
 0x36a   : > { %v743_v5 = vmul.f32 %v1586_v53, %v742_v63  ;;  %v744_v6 = vmul.f32 %v1587_v54, %v741_v62 }
 0x36c   : > { %v750_v13 = vpop.permute.xlu1 %749  ;;  %v745_v22 = vadd.f32 %v743_v5, %v734_v7  ;;  %v746_v23 = vadd.f32 %v744_v6, %v735_v8 }
 0x36d   : > { %v752_v58 = vsel %vm751_vm10, %v748_v55, %v750_v13  ;;  %v753_v59 = vsel %vm751_vm10, %v750_v13, %v748_v55  ;;  %vm1172_vm10 = vcmp.lt.s32.totalorder %v1994_v14, 14 }
 0x36e   : > { %v754_v3 = vmul.f32 %v2017_v56, %v753_v59  ;;  %v755_v4 = vmul.f32 %v2020_v57, %v752_v58 }
 0x370   : > { %v761_v0 = vpop.permute.xlu1 %760  ;;  %v756_v12 = vmul.f32 %v1586_v53, %v754_v3  ;;  %v757_v15 = vmul.f32 %v1587_v54, %v755_v4 }
 0x372   : > { %v758_v28 = vadd.f32 %v756_v12, %v745_v22  ;;  %v759_v29 = vadd.f32 %v757_v15, %v746_v23 }
 0x374   : > { %v763_v52 = vpop.permute.xlu1 %762  ;;  %v783_v18 = vpop.permute.xlu0 %782 }
 0x375   : > { %v765_v16 = vsel %vm764_vm12, %v761_v0, %v763_v52  ;;  %v766_v17 = vsel %vm764_vm12, %v763_v52, %v761_v0  ;;  %vm1218_vm12 = vcmp.lt.s32.totalorder %v1990_v38, 30 }
 0x376   : > { %v767_v25 = vmul.f32 %v1582_v46, %v766_v17  ;;  %v768_v21 = vmul.f32 %v1583_v47, %v765_v16 }
 0x378   : > { %v772_v2 = vpop.permute.xlu1 %771  ;;  %v769_v39 = vadd.f32 %v767_v25, %v758_v28  ;;  %v770_v40 = vadd.f32 %v768_v21, %v759_v29  ;;  %v796_v41 = vpop.permute.xlu0 %795 }
 0x37c   : > { %v774_v9 = vpop.permute.xlu1 %773  ;;  %v807_v53 = vpop.permute.xlu0 %806 }
 0x37d   : > { %v776_v24 = vsel %vm775_vm14, %v772_v2, %v774_v9  ;;  %v777_v20 = vsel %vm775_vm14, %v774_v9, %v772_v2  ;;  %vm1231_vm14 = vcmp.lt.s32.totalorder %v1990_v38, 2 }
 0x37e   : > { %v778_v32 = vmul.f32 %v2017_v56, %v776_v24  ;;  %v779_v35 = vmul.f32 %v2020_v57, %v777_v20 }
 0x380   : > { %v785_v27 = vpop.permute.xlu1 %784  ;;  %v780_v51 = vadd.f32 %v778_v32, %v769_v39  ;;  %v781_v52 = vadd.f32 %v779_v35, %v770_v40  ;;  %v829_v39 = vld [vmem:[%s2201_s7 + $0x8] sm:$0xff] }
 0x381   : > { %v787_v30 = vsel %vm786_vm3, %v783_v18, %v785_v27  ;;  %v788_v31 = vsel %vm786_vm3, %v785_v27, %v783_v18  ;;  %v1693_v27 = vld [vmem:[%s2200_s6] sm:$0xff]   ;;  %vm1242_vm3 = vcmp.lt.s32.totalorder %v1990_v38, 126 }
 0x382   : > { %v789_v36 = vmul.f32 %v1582_v46, %v787_v30  ;;  %v790_v37 = vmul.f32 %v1583_v47, %v788_v31 }
 0x384   : > { %v791_v13 = vmul.f32 %v1588_v19, %v789_v36  ;;  %v792_v0 = vmul.f32 %v1589_v26, %v790_v37  ;;  %v798_v48 = vpop.permute.xlu1 %797  ;;  %v828_v37 = vld [vmem:[%s2201_s7] sm:$0xff] }
 0x385   : > { %v800_v49 = vsel %vm799_vm4, %v796_v41, %v798_v48  ;;  %v801_v50 = vsel %vm799_vm4, %v798_v48, %v796_v41  ;;  %vm1184_vm4 = vcmp.lt.s32.totalorder %v1999_v43, 14 }
 0x386   : > { %v793_v54 = vadd.f32 %v791_v13, %v780_v51  ;;  %v794_v46 = vadd.f32 %v792_v0, %v781_v52  ;;  %v802_v47 = vmul.f32 %v1588_v19, %v800_v49  ;;  %v803_v55 = vmul.f32 %v1589_v26, %v801_v50 }
 0x388   : > { %v809_v58 = vpop.permute.xlu1 %808  ;;  %v804_v63 = vadd.f32 %v802_v47, %v793_v54  ;;  %v805_v2 = vadd.f32 %v803_v55, %v794_v46 }
 0x389   : > { %v811_v59 = vsel %vm810_vm5, %v807_v53, %v809_v58  ;;  %v812_v60 = vsel %vm810_vm5, %v809_v58, %v807_v53  ;;  %v822_v7 = vpop.permute.xlu0 %821  ;;  %vm1185_vm5 = vcmp.lt.s32.totalorder %v2001_v44, 14 }
 0x38a   : > { %v813_v61 = vmul.f32 %v2017_v56, %v811_v59  ;;  %v814_v62 = vmul.f32 %v2020_v57, %v812_v60 }
 0x38c   : > { %v815_v3 = vmul.f32 %v1588_v19, %v813_v61  ;;  %v816_v4 = vmul.f32 %v1589_v26, %v814_v62 }
 0x38e   : > { %v817_v5 = vadd.f32 %v815_v3, %v804_v63  ;;  %v818_v6 = vadd.f32 %v816_v4, %v805_v2 }
 0x390   : > { %v824_v8 = vadd.f32 %v822_v7, %v817_v5  ;;  %v825_v9 = vadd.f32 %v822_v7, %v818_v6 }
 0x392   : > { %v840_v12 = vmul.f32 %v824_v8, %v1926_v10  ;;  %v841_v15 = vmul.f32 %v825_v9, %v1928_v11 }
 0x394   : > { %v844_v16 = vadd.f32 %v841_v15, %v840_v12  ;;  %v1296_v17 = vmul.f32 %v841_v15, %v1928_v11  ;;  %v1295_v56 = vmul.f32 %v840_v12, %v1926_v10 }
 0x396   : > { %845 = vadd.xlane.f32.xlu0 %v844_v16  ;;  %v1303_v57 = vpack.c.bf16 %v1296_v17, %v1296_v17  ;;  %v1302_v18 = vpack.c.bf16 %v1295_v56, %v1295_v56 }
 0x398   : > { %1614 = vmatprep.subr.msk.bf16.mxu1 %vm491_vm0, %v1303_v57  ;;  %v1313_v19 = vsel %vm491_vm0, %v1302_v18, 0 }
 0x399   : > { %1333 = vmatpush1.bf16.msra.mxu1 %v1313_v19 }
 0x3c3   : > { %v862_v22 = vpop.xlane.xlu1 %861 }
 0x3c4   : > { %v863_v23 = vmul.f32 0.00390625, %v862_v22 }
 0x3c6   : > { %v864_v24 = vsub.f32 %v1981_v33, %v863_v23  ;;  %v865_v20 = vsub.f32 %v1985_v34, %v863_v23 }
 0x3c8   : > { %v866_v25 = vmul.f32 %v864_v24, %v864_v24  ;;  %v867_v21 = vmul.f32 %v865_v20, %v865_v20 }
 0x3ca   : > { %v868_v26 = vadd.f32 %v867_v21, %v866_v25 }
 0x3cc   : > { %869 = vadd.xlane.f32.xlu0 %v868_v26 }
 0x3e2   : > { %889 = vrot.lane.b32.xlu0 %v1693_v27, %s1784_s17 }
 0x41f   : > { %v846_v28 = vpop.xlane.xlu0 %845 }
 0x420   : > { %v847_v29 = vmul.f32 0.00390625, %v846_v28 }
 0x422   : > { %v848_v30 = vsub.f32 %v840_v12, %v847_v29  ;;  %v849_v31 = vsub.f32 %v841_v15, %v847_v29 }
 0x424   : > { %v850_v32 = vmul.f32 %v848_v30, %v848_v30  ;;  %v851_v35 = vmul.f32 %v849_v31, %v849_v31 }
 0x426   : > { %v852_v36 = vadd.f32 %v851_v35, %v850_v32 }
 0x428   : > { %853 = vadd.xlane.f32.xlu1 %v852_v36 }
 0x439   : > { %997 = vperm.xlu1 %1686, %v828_v37  }
 0x43d   : > { %1002 = vperm.xlu1 %1686, %v829_v39  }
 0x455   : > { %v870_v40 = vpop.xlane.xlu0 %869 }
 0x456   : > { %v871_v41 = vmul.f32 0.00390625, %v870_v40 }
 0x458   : > { %v872_v13 = vadd.f32 1e-05, %v871_v41 }
 0x459   : > { %v890_v46 = vpop.permute.xlu0 %889 }
 0x45a   : > { %1704 = vrsqrt.f32 %v872_v13 }
 0x467   : > { %v1705_v0 = vpop.eup %1704 }
 0x468   : > { %v875_v48 = vmul.f32 %v1705_v0, %v865_v20  ;;  %v874_v49 = vmul.f32 %v1705_v0, %v864_v24 }
 0x46a   : > { %v879_v50 = vmax.f32 %v875_v48, 0.0  ;;  %v878_v51 = vmax.f32 %v874_v49, 0.0 }
 0x46c   : > { %v883_v52 = vpack.c.bf16 %v879_v50, %v879_v50  ;;  %v882_v53 = vpack.c.bf16 %v878_v51, %v878_v51 }
 0x46e   : > { %1591 = vmatprep.subr.msk.bf16.mxu0 %vm491_vm0, %v883_v52  ;;  %v895_v54 = vsel %vm491_vm0, %v882_v53, 0 }
 0x46f   : > { %915 = vmatpush1.bf16.msra.mxu0 %v895_v54 }
 0x472   : > { %1592 = vmatmul.mubr.msk.bf16.vlgmr.msra.gmra.mxu0 %vm487_vm1, %v890_v46 }
 0x473   : > { %984 = vmatprep.mubr.bf16.mxu0 %v1774_v1 }
 0x4b1   : > { %v854_v47 = vpop.xlane.xlu1 %853 }
 0x4b2   : > { %v855_v55 = vmul.f32 0.00390625, %v854_v47 }
 0x4b4   : > { %v856_v58 = vadd.f32 1e-05, %v855_v55 }
 0x4b5   : > { %v998_v15 = vpop.permute.xlu1 %997 }
 0x4b6   : > { %1706 = vrsqrt.f32 %v856_v58 }
 0x4b9   : > { %v1003_v20 = vpop.permute.xlu1 %1002 }
 0x4c3   : > { %v1707_v59 = vpop.eup %1706 }
 0x4c4   : > { %v859_v60 = vmul.f32 %v1707_v59, %v849_v31  ;;  %v858_v61 = vmul.f32 %v1707_v59, %v848_v30 }
 0x4c6   : > { %v877_v62 = vmax.f32 %v859_v60, 0.0  ;;  %v876_v63 = vmax.f32 %v858_v61, 0.0 }
 0x4c8   : > { %v881_v2 = vpack.c.bf16 %v877_v62, %v877_v62  ;;  %v880_v3 = vpack.c.bf16 %v876_v63, %v876_v63 }
 0x4ca   : > { %1593 = vmatprep.subr.msk.bf16.mxu0 %vm491_vm0, %v881_v2  ;;  %v947_v4 = vsel %vm491_vm0, %v880_v3, 0 }
 0x4cb   : > { %967 = vmatpush1.bf16.msra.mxu0 %v947_v4  ;;  %v1694_v4 = vld [vmem:[%s2202_s8] sm:$0xff]  }
 0x4ce   : > { %1594 = vmatmul.mubr.msk.bf16.vlgmr.msra.gmra.mxu0 %vm487_vm1, %v1693_v27 }
 0x4cf   : > { %1117 = vmatprep.mubr.bf16.mxu0 %v1774_v1 }
 0x532   : > { %v934_v5 = vpop.f32.mrf.mxu0 }
 0x534   : > { %v936_v6 = vpop.f32.mrf.mxu0 }
 0x536   : > { %v938_v7 = vpop.f32.mrf.mxu0 }
 0x538   : > { %v940_v8 = vpop.f32.mrf.mxu0 }
 0x58e   : > { %v986_v9 = vpop.f32.mrf.mxu0 }
 0x58f   : > { %v987_v12 = vadd.f32 %v986_v9, %v934_v5  ;;  %v1695_v5 = vld [vmem:[%s2202_s8 + $0x8] sm:$0xff]  }
 0x590   : > { %v988_v16 = vpop.f32.mrf.mxu0 }
 0x591   : > { %v989_v17 = vadd.f32 %v988_v16, %v936_v6  ;;  %v1005_v57 = vadd.f32 %v998_v15, %v987_v12  ;;  %v1696_v6 = vld [vmem:[%s2202_s8 + $0x10] sm:$0xff]  }
 0x592   : > { %v990_v56 = vpop.f32.mrf.mxu0 }
 0x593   : > { %v1006_v18 = vadd.f32 %v998_v15, %v989_v17  ;;  %v991_v19 = vadd.f32 %v990_v56, %v938_v7  ;;  %v1697_v7 = vld [vmem:[%s2202_s8 + $0x18] sm:$0xff]  }
 0x594   : > { %v992_v22 = vpop.f32.mrf.mxu0 }
 0x595   : > { %v993_v23 = vadd.f32 %v992_v22, %v940_v8  ;;  %v1009_v24 = vadd.f32 %v1006_v18, %v1005_v57  ;;  %v1007_v25 = vadd.f32 %v1003_v20, %v991_v19  ;;  %v1698_v8 = vld [vmem:[%s2202_s8 + $0x20] ss:$0 sps:$4 sm:$0xff]  }
 0x597   : > { %v1008_v21 = vadd.f32 %v1003_v20, %v993_v23  ;;  %1010 = vadd.xlane.f32.xlu0 %v1009_v24 }
 0x599   : > { %v1012_v26 = vadd.f32 %v1008_v21, %v1007_v25 }
 0x59b   : > { %1013 = vadd.xlane.f32.xlu1 %v1012_v26 }
 0x620   : > { %v1011_v27 = vpop.xlane.xlu0 %1010 }
 0x621   : > { %v1015_v28 = vmul.f32 0.00390625, %v1011_v27 }
 0x623   : > { %v1017_v29 = vsub.f32 %v1005_v57, %v1015_v28  ;;  %v1018_v30 = vsub.f32 %v1006_v18, %v1015_v28  ;;  %v2100_v28 = vld [vmem:[%s2204_s10] sm:$0xf] }
 0x624   : > { %v1014_v31 = vpop.xlane.xlu1 %1013 }
 0x625   : > { %v1016_v32 = vmul.f32 0.00390625, %v1014_v31  ;;  %v1021_v35 = vmul.f32 %v1017_v29, %v1017_v29  ;;  %v1022_v36 = vmul.f32 %v1018_v30, %v1018_v30  ;;  %v1613_v31 = vcombine.low %v2100_v28, %v2100_v28 }
 0x627   : > { %v1019_v37 = vsub.f32 %v1007_v25, %v1016_v32  ;;  %v1020_v39 = vsub.f32 %v1008_v21, %v1016_v32  ;;  %v1025_v40 = vadd.f32 %v1022_v36, %v1021_v35  ;;  %v1465_v36 = vld [vmem:[%s2205_s11] sm:$0xff] }
 0x629   : > { %1026 = vadd.xlane.f32.xlu0 %v1025_v40  ;;  %v1023_v41 = vmul.f32 %v1019_v37, %v1019_v37  ;;  %v1024_v13 = vmul.f32 %v1020_v39, %v1020_v39 }
 0x62b   : > { %v1028_v0 = vadd.f32 %v1024_v13, %v1023_v41 }
 0x62d   : > { %1029 = vadd.xlane.f32.xlu0 %v1028_v0 }
 0x6b2   : > { %v1027_v48 = vpop.xlane.xlu0 %1026 }
 0x6b3   : > { %v1031_v49 = vmul.f32 0.00390625, %v1027_v48 }
 0x6b5   : > { %v1033_v50 = vadd.f32 1e-05, %v1031_v49  ;;  %v1606_v49 = vsel %vm1167_vm6, 1.0, %v1783_v45  ;;  %vm1277_vm6 = vcmp.lt.s32.totalorder %v1990_v38, 94 }
 0x6b6   : > { %v1030_v51 = vpop.xlane.xlu0 %1029 }
 0x6b7   : > { %1708 = vrsqrt.f32 %v1033_v50  ;;  %v1032_v52 = vmul.f32 0.00390625, %v1030_v51 }
 0x6b9   : > { %v1034_v53 = vadd.f32 1e-05, %v1032_v52 }
 0x6bb   : > { %1710 = vrsqrt.f32 %v1034_v53 }
 0x6c4   : > { %v1709_v54 = vpop.eup %1708 }
 0x6c5   : > { %v1038_v46 = vmul.f32 %v1709_v54, %v1018_v30  ;;  %v1037_v47 = vmul.f32 %v1709_v54, %v1017_v29  ;;  %v839_v30 = vld [vmem:[%s2203_s9] sm:$0xff] }
 0x6c7   : > { %v1042_v60 = vmax.f32 %v1038_v46, 0.0  ;;  %v1041_v62 = vmax.f32 %v1037_v47, 0.0  ;;  %v1609_v46 = vsel %vm1178_vm8, 1.0, %v1783_v45  ;;  %v1610_v47 = vsel %vm1179_vm9, 1.0, %v1783_v45 }
 0x6c8   : > { %v1711_v55 = vpop.eup %1710 }
 0x6c9   : > { %v1040_v58 = vmul.f32 %v1711_v55, %v1020_v39  ;;  %v1039_v59 = vmul.f32 %v1711_v55, %v1019_v37  ;;  %v1607_v55 = vsel %vm1172_vm10, 1.0, %v1783_v45 }
 0x6cb   : > { %v1044_v61 = vmax.f32 %v1040_v58, 0.0  ;;  %v1043_v63 = vmax.f32 %v1039_v59, 0.0  ;;  %v1608_v58 = vsel %vm1173_vm11, 1.0, %v1783_v45 }
 0x6cd   : > { %v1046_v2 = vpack.c.bf16 %v1044_v61, %v1042_v60  ;;  %v1045_v3 = vpack.c.bf16 %v1043_v63, %v1041_v62 }
 0x6cf   : > { %1099 = vmatprep.subr.bf16.mxu0 %v1046_v2 }
 0x6d0   : > { %1100 = vmatpush1.bf16.msra.mxu0 %v1045_v3 }
 0x6d3   : > { %1600 = vmatmul.mubr.msk.bf16.vlgmr.msra.gmra.mxu0 %vm602_vm2, %v1694_v4 }
 0x6d4   : > { %1127 = vmatprep.mubr.bf16.mxu0 %v1774_v1 }
 0x6db   : > { %1601 = vmatmul.mubr.msk.bf16.gmra.mxu0 %vm602_vm2, %v1695_v5 }
 0x6dc   : > { %1137 = vmatprep.mubr.bf16.mxu0 %v1774_v1 }
 0x6e3   : > { %1602 = vmatmul.mubr.msk.bf16.gmra.mxu0 %vm602_vm2, %v1696_v6 }
 0x6e4   : > { %1147 = vmatprep.mubr.bf16.mxu0 %v1774_v1 }
 0x6eb   : > { %1603 = vmatmul.mubr.msk.bf16.gmra.mxu0 %vm602_vm2, %v1697_v7 }
 0x6ec   : > { %1157 = vmatprep.mubr.bf16.mxu0 %v1774_v1 }
 0x6f3   : > { %1604 = vmatmul.mubr.msk.bf16.gmra.mxu0 %vm602_vm2, %v1698_v8  ;;  %vm1166_vm2 = vcmp.ge.s32.totalorder %v1994_v14, 2 }
 0x6f4   : > { %v1605_v48 = vsel %vm1166_vm2, 1.0, %v1783_v45  ;;  %vm1266_vm2 = vcmp.lt.s32.totalorder %v1990_v38, 96 }
 0x793   : > { %v1119_v9 = vpop.f32.mrf.mxu0 }
 0x794   : > { %1190 = vrot.lane.b32.xlu1 %v1119_v9, %s1785_s15 }
 0x795   : > { %v1121_v12 = vpop.f32.mrf.mxu0 }
 0x796   : > { %1192 = vrot.lane.b32.xlu0 %v1121_v12, %s1785_s15  ;;  %s1792_s15 = smov 94  }
 0x797   : > { %v1123_v15 = vpop.f32.mrf.mxu0 }
 0x798   : > { %1203 = vrot.lane.b32.xlu1 %v1123_v15, %s1786_s16 }
 0x799   : > { %v1125_v16 = vpop.f32.mrf.mxu0 }
 0x79b   : > { %v1129_v17 = vpop.f32.mrf.mxu0 }
 0x79c   : > { %1205 = vrot.lane.b32.xlu1 %v1125_v16, %s1786_s16  ;;  %1214 = vrot.lane.b32.xlu0 %v1129_v17, %s1787_s23 }
 0x79d   : > { %v1131_v56 = vpop.f32.mrf.mxu0 }
 0x79f   : > { %v1133_v57 = vpop.f32.mrf.mxu0 }
 0x7a0   : > { %1216 = vrot.lane.b32.xlu1 %v1131_v56, %s1787_s23  ;;  %1227 = vrot.lane.b32.xlu0 %v1133_v57, %s1788_s30 }
 0x7a1   : > { %v1135_v18 = vpop.f32.mrf.mxu0 }
 0x7a3   : > { %v2093_v19 = vpop.f32.mrf.mxu0 }
 0x7a4   : > { %1229 = vrot.lane.b32.xlu1 %v1135_v18, %s1788_s30 }
 0x7a5   : > { %v2095_v22 = vpop.f32.mrf.mxu0 }
 0x7a7   : > { %v1143_v23 = vpop.f32.mrf.mxu0 }
 0x7a8   : > { %1238 = vrot.lane.b32.xlu0 %v1143_v23, %s1789_s18 }
 0x7a9   : > { %v1145_v24 = vpop.f32.mrf.mxu0 }
 0x7aa   : > { %1240 = vrot.lane.b32.xlu1 %v1145_v24, %s1789_s18 }
 0x7ab   : > { %v1149_v20 = vpop.f32.mrf.mxu0 }
 0x7ac   : > { %1249 = vrot.lane.b32.xlu0 %v1149_v20, %s1790_s19 }
 0x7ad   : > { %v1151_v25 = vpop.f32.mrf.mxu0 }
 0x7ae   : > { %1251 = vrot.lane.b32.xlu1 %v1151_v25, %s1790_s19  ;;  %s1626_s19 = sshll.u32 %s1880_s25, 8  ;;  %s1793_s25 = smov [#allocation2]  }
 0x7af   : > { %v1153_v21 = vpop.f32.mrf.mxu0  ;;  %s2159_s16 = scalar_lea.hbm %s2206_s12, %s1626_s19  ;;  %s1716_s18 = sshll.u32 %s1793_s25, 4  ;;  %s1717_s18 = int_to_ptr.vmem [resolvable:$false] %s1716_s18 }
 0x7b0   : > { %1262 = vrot.lane.b32.xlu0 %v1153_v21, %s1791_s20 }
 0x7b1   : > { %v1155_v26 = vpop.f32.mrf.mxu0 }
 0x7b2   : > { %1264 = vrot.lane.b32.xlu1 %v1155_v26, %s1791_s20 }
 0x7b3   : > { %v1159_v27 = vpop.f32.mrf.mxu0 }
 0x7b4   : > { %1273 = vrot.lane.b32.xlu0 %v1159_v27, %s1792_s15 }
 0x7b5   : > { %v1161_v29 = vpop.f32.mrf.mxu0 }
 0x7b6   : > { %1275 = vrot.lane.b32.xlu1 %v1161_v29, %s1792_s15 }
 0x7b7   : > { %v1163_v32 = vpop.f32.mrf.mxu0 }
 0x7b8   : > { %1288 = vperm.xlu0 %1685, %v839_v30  }
 0x7b9   : > { %v1164_v35 = vpop.f32.mrf.mxu0 }
 0x7ba   : > { %1307 = vrot.lane.b32.xlu1 %v1613_v31, %s1784_s17  ;;  %v1611_v35 = vsel %vm1184_vm4, 1.0, %v1783_v45 }
 0x7bc   : > { %1411 = vrot.lane.b32.xlu0 %v1613_v31, %s1781_s28  ;;  %s417_s28 = sand.u32 1, %s1764_s22  }
 0x7bd   : > { %s1565_s17 = sshll.u32 %s417_s28, 4  ;;  %s1476_s23 = scalar_lea.sflag [#allocation3], %s417_s28 }
 0x7be   : > { %1468 = vperm.xlu1 %1686, %v1465_v36   ;;  %v1612_v36 = vsel %vm1185_vm5, 1.0, %v1783_v45  ;;  %s419_s20 = scalar_lea.vmem [#allocation2], %s1565_s17  ;;  %s1718_s17 = scalar_lea.vmem %s1717_s18, 512 }
 0x7bf   : > { %s1490_s26 = sshll.u32 %s419_s20, 4  ;;  %s1491_s26 = int_to_ptr.vmem [resolvable:$true] %s1490_s26 }
 0x7c0   : > { %s1712_s30 = scalar_lea.vmem %s1491_s26, 256  ;;  %p1719_p0 = scmp.lt.s32.totalorder %s1491_s26, %s1717_s18 }
 0x7c1   : > { %p1713_p11 = scmp.ne.s32.totalorder %s1491_s26, %s1712_s30  ;;  %p1720_p1 = scmp.lt.s32.totalorder %s1718_s17, %s1712_s30 }
 0x7c3   : > { %p1714_p12 = pnand %p1713_p11, %p1897_p5  ;;  %p1721_p2 = por %p1720_p1, %p1719_p0 }
 0x7c5   : > { %p1715_p13 = pneg %p1714_p12 }
 0x7c7   : > { %p1722_p3 = pnand %p1721_p2, %p1715_p13 }
 0x806   : > { %v1191_v37 = vpop.permute.xlu1 %1190 }
 0x808   : > { %v1193_v40 = vpop.permute.xlu0 %1192 }
 0x809   : > { %v1195_v50 = vsel %vm1194_vm7, %v1191_v37, %v1193_v40  ;;  %v1196_v51 = vsel %vm1194_vm7, %v1193_v40, %v1191_v37 }
 0x80a   : > { %v1204_v39 = vpop.permute.xlu1 %1203  ;;  %v1197_v52 = vmul.f32 %v1605_v48, %v1196_v51  ;;  %v1198_v53 = vmul.f32 %v1606_v49, %v1195_v50 }
 0x80c   : > { %v1199_v62 = vmul.f32 %v1609_v46, %v1197_v52  ;;  %v1200_v63 = vmul.f32 %v1610_v47, %v1198_v53 }
 0x80e   : > { %v1206_v41 = vpop.permute.xlu1 %1205  ;;  %v1215_v13 = vpop.permute.xlu0 %1214  ;;  %v1201_v8 = vadd.f32 %v1199_v62, %v2093_v19  ;;  %v1202_v9 = vadd.f32 %v1200_v63, %v2095_v22 }
 0x80f   : > { %v1208_v61 = vsel %vm1207_vm13, %v1204_v39, %v1206_v41  ;;  %v1209_v42 = vsel %vm1207_vm13, %v1206_v41, %v1204_v39 }
 0x810   : > { %v1210_v5 = vmul.f32 %v1609_v46, %v1209_v42  ;;  %v1211_v6 = vmul.f32 %v1610_v47, %v1208_v61 }
 0x812   : > { %v1217_v0 = vpop.permute.xlu1 %1216  ;;  %v1228_v54 = vpop.permute.xlu0 %1227  ;;  %v1212_v17 = vadd.f32 %v1210_v5, %v1201_v8  ;;  %v1213_v56 = vadd.f32 %v1211_v6, %v1202_v9 }
 0x813   : > { %v1219_v59 = vsel %vm1218_vm12, %v1215_v13, %v1217_v0  ;;  %v1220_v60 = vsel %vm1218_vm12, %v1217_v0, %v1215_v13 }
 0x814   : > { %v1221_v3 = vmul.f32 %v1607_v55, %v1220_v60  ;;  %v1222_v4 = vmul.f32 %v1608_v58, %v1219_v59 }
 0x816   : > { %v1230_v14 = vpop.permute.xlu1 %1229  ;;  %v1223_v15 = vmul.f32 %v1609_v46, %v1221_v3  ;;  %v1224_v16 = vmul.f32 %v1610_v47, %v1222_v4 }
 0x817   : > { %v1232_v18 = vsel %vm1231_vm14, %v1228_v54, %v1230_v14  ;;  %v1233_v23 = vsel %vm1231_vm14, %v1230_v14, %v1228_v54 }
 0x818   : > { %v1225_v22 = vadd.f32 %v1223_v15, %v1212_v17  ;;  %v1226_v25 = vadd.f32 %v1224_v16, %v1213_v56  ;;  %v1234_v27 = vmul.f32 %v1605_v48, %v1233_v23  ;;  %v1235_v29 = vmul.f32 %v1606_v49, %v1232_v18 }
 0x81a   : > { %v1239_v2 = vpop.permute.xlu0 %1238  ;;  %v1236_v43 = vadd.f32 %v1234_v27, %v1225_v22  ;;  %v1237_v44 = vadd.f32 %v1235_v29, %v1226_v25 }
 0x81c   : > { %v1241_v7 = vpop.permute.xlu1 %1240 }
 0x81d   : > { %v1243_v21 = vsel %vm1242_vm3, %v1239_v2, %v1241_v7  ;;  %v1244_v26 = vsel %vm1242_vm3, %v1241_v7, %v1239_v2 }
 0x81e   : > { %v1250_v12 = vpop.permute.xlu0 %1249  ;;  %v1245_v37 = vmul.f32 %v1607_v55, %v1243_v21  ;;  %v1246_v39 = vmul.f32 %v1608_v58, %v1244_v26 }
 0x820   : > { %v1252_v57 = vpop.permute.xlu1 %1251  ;;  %v1247_v52 = vadd.f32 %v1245_v37, %v1236_v43  ;;  %v1248_v53 = vadd.f32 %v1246_v39, %v1237_v44 }
 0x821   : > { %v1254_v24 = vsel %vm1253_vm15, %v1250_v12, %v1252_v57  ;;  %v1255_v20 = vsel %vm1253_vm15, %v1252_v57, %v1250_v12 }
 0x822   : > { %v1263_v19 = vpop.permute.xlu0 %1262  ;;  %v1256_v30 = vmul.f32 %v1605_v48, %v1254_v24  ;;  %v1257_v31 = vmul.f32 %v1606_v49, %v1255_v20 }
 0x824   : > { %v1265_v32 = vpop.permute.xlu1 %1264  ;;  %v1258_v40 = vmul.f32 %v1611_v35, %v1256_v30  ;;  %v1259_v41 = vmul.f32 %v1612_v36, %v1257_v31 }
 0x825   : > { %v1267_v50 = vsel %vm1266_vm2, %v1263_v19, %v1265_v32  ;;  %v1268_v48 = vsel %vm1266_vm2, %v1265_v32, %v1263_v19 }
 0x826   : > { %v1274_v13 = vpop.permute.xlu0 %1273  ;;  %v1260_v46 = vadd.f32 %v1258_v40, %v1247_v52  ;;  %v1261_v47 = vadd.f32 %v1259_v41, %v1248_v53  ;;  %v1269_v59 = vmul.f32 %v1611_v35, %v1267_v50  ;;  %v1270_v60 = vmul.f32 %v1612_v36, %v1268_v48 }
 0x828   : > { %v1276_v0 = vpop.permute.xlu1 %1275  ;;  %v1271_v42 = vadd.f32 %v1269_v59, %v1260_v46  ;;  %v1272_v62 = vadd.f32 %v1270_v60, %v1261_v47 }
 0x829   : > { %v1278_v49 = vsel %vm1277_vm6, %v1274_v13, %v1276_v0  ;;  %v1279_v51 = vsel %vm1277_vm6, %v1276_v0, %v1274_v13 }
 0x82a   : > { %v1280_v54 = vmul.f32 %v1607_v55, %v1278_v49  ;;  %v1281_v45 = vmul.f32 %v1608_v58, %v1279_v51  ;;  %v1298_v55 = vmul.f32 %v1985_v34, %v1928_v11  ;;  %v1297_v58 = vmul.f32 %v1981_v33, %v1926_v10 }
 0x82c   : > { %v1308_v14 = vpop.permute.xlu1 %1307  ;;  %v1282_v38 = vmul.f32 %v1611_v35, %v1280_v54  ;;  %v1283_v61 = vmul.f32 %v1612_v36, %v1281_v45  ;;  %v1410_v12 = vpack.c.bf16 %v1298_v55, %v1298_v55  ;;  %v1409_v15 = vpack.c.bf16 %v1297_v58, %v1297_v58 }
 0x82d   : > { %1615 = vmatmul.mubr.msk.bf16.vlgmr.msra.gmra.mxu1 %vm487_vm1, %v1308_v14 }
 0x82e   : > { %1400 = vmatprep.mubr.bf16.mxu1 %v1774_v1  ;;  %v1284_v63 = vadd.f32 %v1282_v38, %v1271_v42  ;;  %v1285_v2 = vadd.f32 %v1283_v61, %v1272_v62  ;;  %v1417_v34 = vsel %vm491_vm0, %v1409_v15, 0 }
 0x833   : > { %v1289_v3 = vpop.permute.xlu0 %1288 }
 0x834   : > { %v1291_v4 = vadd.f32 %v1289_v3, %v1284_v63  ;;  %v1292_v5 = vadd.f32 %v1289_v3, %v1285_v2 }
 0x836   : > { %v1293_v6 = vmul.f32 %v1291_v4, %v1926_v10  ;;  %v1294_v7 = vmul.f32 %v1292_v5, %v1928_v11 }
 0x837   : > { %v1412_v10 = vpop.permute.xlu0 %1411 }
 0x838   : > { %v1300_v8 = vpack.c.bf16 %v1293_v6, %v1293_v6  ;;  %v1301_v9 = vpack.c.bf16 %v1294_v7, %v1294_v7 }
 0x839   : > { %v1469_v25 = vpop.permute.xlu1 %1468 }
 0x83a   : > { %1616 = vmatprep.subr.msk.bf16.mxu1 %vm491_vm0, %v1301_v9  ;;  %v1363_v16 = vsel %vm491_vm0, %v1300_v8, 0 }
 0x83b   : > { %1383 = vmatpush1.bf16.msra.mxu1 %v1363_v16 }
 0x83c   : > { %1618 = vmatprep.subr.msk.bf16.mxu1 %vm491_vm0, %v1410_v12 }
 0x83e   : > { %1617 = vmatmul.mubr.msk.bf16.vlgmr.msra.gmra.mxu1 %vm487_vm1, %v2100_v28 }
 0x83f   : > { %1437 = vmatpush1.bf16.msra.mxu1 %v1417_v34  ;;  %1454 = vmatprep.mubr.bf16.mxu1 %v1774_v1 }
 0x846   : > { %1619 = vmatmul.mubr.msk.bf16.vlgmr.msra.gmra.mxu1 %vm487_vm1, %v1412_v10 }
 0x8ed   : > { %v1352_v11 = vpop.f32.mrf.mxu1 }
 0x8ef   : > { %v1354_v33 = vpop.f32.mrf.mxu1 }
 0x8f1   : > { %v1356_v17 = vpop.f32.mrf.mxu1 }
 0x8f3   : > { %v1357_v56 = vpop.f32.mrf.mxu1 }
 0x8fe   : > { %v1402_v57 = vpop.f32.mrf.mxu1 }
 0x8ff   : > { %v1403_v20 = vadd.f32 %v1402_v57, %v1352_v11 }
 0x900   : > { %v1404_v18 = vpop.f32.mrf.mxu1 }
 0x901   : > { %v1405_v28 = vadd.f32 %v1404_v18, %v1354_v33 }
 0x902   : > { %v1406_v23 = vpop.f32.mrf.mxu1 }
 0x904   : > { %v1407_v24 = vpop.f32.mrf.mxu1 }
 0x906   : > { %v1456_v19 = vpop.f32.mrf.mxu1 }
 0x907   : > { %v1463_v22 = vadd.f32 %v1456_v19, %v1403_v20 }
 0x908   : > { %v1458_v1 = vpop.f32.mrf.mxu1 }
 0x909   : > { %v1471_v21 = vadd.f32 %v1469_v25, %v1463_v22  ;;  %v1464_v26 = vadd.f32 %v1458_v1, %v1405_v28 }
 0x90a   : > { %v1460_v27 = vpop.f32.mrf.mxu1 }
 0x90b   : > { %1473 = vst [vmem:[%s419_s20] sm:$0xff] %v1471_v21  ;;  %v1472_v29 = vadd.f32 %v1469_v25, %v1464_v26 }
 0x90c   : > { %v1461_v30 = vpop.f32.mrf.mxu1 }
 0x90d   : > { %1474 = vst [vmem:[%s419_s20 + $0x8] sm:$0xff] %v1472_v29 }
 0x90e   : > { %1725 = shalt.err (!%p1722_p3)
}
 0x90f   : > { %s1726_s19 = scalar_lea.hbm %s2159_s16, 256  ;;  %s1730_s29 = scalar_lea.hbm %s2206_s12, 512 }
 0x910   : > { %p1727_p4 = scmp.ne.s32.totalorder %s2159_s16, %s1726_s19  ;;  %p1731_p9 = scmp.lt.s32.totalorder %s2159_s16, %s2206_s12 }
 0x911   : > { %p1732_p10 = scmp.lt.s32.totalorder %s1730_s29, %s1726_s19 }
 0x912   : > { %p1728_p7 = pnand %p1727_p4, %p1897_p5 }
 0x913   : > { %p1733_p11 = por %p1732_p10, %p1731_p9 }
 0x914   : > { %p1729_p8 = pneg %p1728_p7 }
 0x916   : > { %p1734_p12 = pnand %p1733_p11, %p1729_p8 }
 0x918   : > { %1737 = shalt.err (!%p1734_p12)
}
 0x919   : > { %1627 = dma.vmem_to_hbm [thread:$0]  (%p1897_p5), %s1491_s26, 256, %s2159_s16, %s1476_s23  }
 0x91a PF: > { %p1633_p13 = scmp.ge.s32.totalorder %s1772_s24, 2  ;;  %s1502_s30 = sand.u32 1, %s1760_s21  }
 0x91b   : > { %s1503_s18 = scalar_lea.sflag [#allocation3], %s1502_s30 }
 0x91c   : > { %p1630_p0 = pnand %p1633_p13, %p1901_p6 }
 0x91e   : > { %p1631_p1 = pneg %p1630_p0 }
 0x920   : > { %1755 = dma.done.wait (%p1631_p1), %s1503_s18, 256  }
 0x921   : > { %1757 = vsyncadd (%p1631_p1), %s1503_s18, 4294967040  ;;  %s2212_s17 = sld [smem:[#allocation5_spill]]  ;;  %p22_p2 = scmp.ge.s32.totalorder %s1884_s27, 4  }
 0x922   : > { %s2213_s23 = sld [smem:[#allocation6_spill]]  ;;  %s2214_s21 = smov %s1764_s22 }
 0x923   : > { %s2216_s24 = smov %s1884_s27  ;;  %24 = sbr.rel (!%p22_p2) target bundleno = 3 (0x3), region = 106 }
 0x927   : > { %s2215_s22 = smov %s2212_s17 }
 0x928   :  { %1508 = vsyncpa [#allocation3], 1 }
 0x929   :  { %1510 = vsyncpa [#allocation3 + $0x1], 1 }

</bundles_post_ra>
